<compile_context>
chip_gen: v5e
topology: v5e:2x2
jax: 0.10.0
libtpu: 0.0.40
codegen_flags: <defaults>
</compile_context>

<pallas_src>
import functools
import math

import numpy as np
import jax
import jax.numpy as jnp
from jax.experimental import pallas as pl
from jax.experimental.pallas import tpu as pltpu


_SQRT_2_OVER_PI = 0.7978845608028654


# ---------------------------------------------------------------------------
# In-kernel helpers (pure jnp, traced inside the Pallas kernel)
# ---------------------------------------------------------------------------

def _gelu(x):
    # tanh-approximate GELU: routes the transcendental to the EUP slot.
    # TODO(synk): ~1e-3-level deviation vs torch's exact erf-GELU.
    return 0.5 * x * (1.0 + jnp.tanh(_SQRT_2_OVER_PI * (x + 0.044715 * (x * x * x))))


def _delayed(v, d):
    """out[t] = v[t-d] (zeros for t < d).  v: (T, C), d >= 0 static."""
    T = v.shape[0]
    if d == 0:
        return v
    if d >= T:
        return jnp.zeros_like(v)
    rows = jax.lax.broadcasted_iota(jnp.int32, v.shape, 0)
    return jnp.where(rows >= d, pltpu.roll(v, shift=d, axis=0), 0.0)


def _advanced(v, d):
    """out[t] = v[t+d] (zeros for t >= T-d).  v: (T, C), d >= 0 static."""
    T = v.shape[0]
    if d == 0:
        return v
    if d >= T:
        return jnp.zeros_like(v)
    rows = jax.lax.broadcasted_iota(jnp.int32, v.shape, 0)
    return jnp.where(rows < T - d, pltpu.roll(v, shift=T - d, axis=0), 0.0)


# ---------------------------------------------------------------------------
# Fused forward kernel: input_fc (+mask) -> dilated conv blocks -> trend+season
# ---------------------------------------------------------------------------

def _cost_fused_kernel(*refs, block_meta, kmax, n_chunks, use_mask):
    pos = 0

    def take(n):
        nonlocal pos
        out = refs[pos:pos + n]
        pos += n
        return out

    (x_ref,) = take(1)
    m_ref = take(1)[0] if use_mask else None
    (fcw_ref, fcb_ref) = take(2)
    block_refs = [take(6 if has_proj else 4) for (_, has_proj) in block_meta]
    (tw_ref, tb_ref) = take(2)
    chunk_refs = [take(6) for _ in range(n_chunks)]
    (out_ref,) = take(1)

    f32 = jnp.float32
    bf16 = jnp.bfloat16

    # ---- input_fc (+ optional mask) ----
    x = x_ref[0]                                                    # (T, Din)
    h = jnp.dot(x.astype(bf16), fcw_ref[...],
                preferred_element_type=f32) + fcb_ref[...]          # (T, H)
    if use_mask:
        h = h * m_ref[0]

    # ---- DilatedConvEncoder: 3 taps folded into one K=3*Cin matmul per conv ----
    for (dilation, has_proj), brefs in zip(block_meta, block_refs):
        if has_proj:
            w1_ref, b1_ref, w2_ref, b2_ref, wp_ref, bp_ref = brefs
            residual = jnp.dot(h.astype(bf16), wp_ref[...],
                               preferred_element_type=f32) + bp_ref[...]
        else:
            w1_ref, b1_ref, w2_ref, b2_ref = brefs
            residual = h

        g = _gelu(h)
        g3 = jnp.concatenate(
            [_delayed(g, dilation), g, _advanced(g, dilation)], axis=1
        ).astype(bf16)                                              # (T, 3*Cin)
        acc = jnp.dot(g3, w1_ref[...], preferred_element_type=f32) + b1_ref[...]

        g2 = _gelu(acc)
        g23 = jnp.concatenate(
            [_delayed(g2, dilation), g2, _advanced(g2, dilation)], axis=1
        ).astype(bf16)                                              # (T, 3*Cout)
        h = (jnp.dot(g23, w2_ref[...], preferred_element_type=f32)
             + b2_ref[...] + residual)                              # (T, Cout)

    # ---- trend: folded causal conv as ONE matmul with K = kmax*Co ----
    parts = [_delayed(h, d) for d in range(kmax)]
    hs = parts[0] if kmax == 1 else jnp.concatenate(parts, axis=1)  # (T, kmax*Co)
    tr = jnp.dot(hs.astype(bf16), tw_ref[...],
                 preferred_element_type=f32) + tb_ref[...]          # (T, Cc)

    # ---- season: fused rfft / per-freq complex linear / irfft, F-chunked ----
    T = h.shape[0]
    Cc = tr.shape[1]
    h_bf = h.astype(bf16)
    season = jnp.zeros((T, Cc), f32)
    for (fwd_ref, wre_ref, wim_ref, bre_ref, bim_ref, inv_ref) in chunk_refs:
        xcat = jnp.dot(fwd_ref[...], h_bf,
                       preferred_element_type=f32)                  # (2*ft, Co)
        ft = xcat.shape[0] // 2
        xre3 = xcat[:ft][:, :, None]                                # (ft, Co, 1)
        xim3 = xcat[ft:][:, :, None]
        wre = wre_ref[...]                                          # (ft, Co, Cc)
        wim = wim_ref[...]
        yre = jnp.sum(xre3 * wre - xim3 * wim, axis=1) + bre_ref[...]   # (ft, Cc)
        yim = jnp.sum(xre3 * wim + xim3 * wre, axis=1) + bim_ref[...]   # (ft, Cc)
        ycat = jnp.concatenate([yre, yim], axis=0).astype(bf16)         # (2*ft, Cc)
        season = season + jnp.dot(inv_ref[...], ycat,
                                  preferred_element_type=f32)           # (T, Cc)

    # single lane-dense write: [trend | season]
    out_ref[0] = jnp.concatenate([tr, season], axis=-1)             # (T, 2*Cc)


# ---------------------------------------------------------------------------
# Host-side parameter / constant preparation
# ---------------------------------------------------------------------------

def _dft_matrices(T):
    """rfft / irfft bases in float64 with exact (f*t) mod T angle reduction."""
    F = T // 2 + 1
    ft = np.mod(np.outer(np.arange(F, dtype=np.int64),
                         np.arange(T, dtype=np.int64)), T).astype(np.float64)
    ang = 2.0 * np.pi * ft / T
    cmat = np.cos(ang)              # X_re = C @ x
    smat = -np.sin(ang)             # X_im = S @ x
    eye = np.eye(F, dtype=np.complex128)
    are = np.fft.irfft(eye, n=T, axis=1).T          # (T, F): real-coef basis
    aim = np.fft.irfft(1j * eye, n=T, axis=1).T     # (T, F): imag-coef basis
    return cmat, smat, are, aim


def _fold_trend_heads(tfd_params, kernels):
    """Exactly fold the mean over causal-conv heads into one K=max(kernels) conv."""
    kmax = max(kernels)
    _, Co, Cc = tfd_params[0]["w"].shape
    n = float(len(kernels))
    wc = jnp.zeros((kmax, Co, Cc), jnp.float32)
    bc = jnp.zeros((1, Cc), jnp.float32)
    for k, p in zip(kernels, tfd_params):
        # delay-form: output[t] = sum_d x[t-d] @ w[k-1-d]  (d < k)
        for d in range(k):
            wc = wc.at[d].add(p["w"][k - 1 - d] / n)
        bc = bc + p["b"] / n
    return wc, bc, kmax


_BUFFERED_ONE_CACHE = "unprobed"


def _buffered_one():
    """Probe once whether this build accepts single-buffered constant inputs."""
    global _BUFFERED_ONE_CACHE
    if _BUFFERED_ONE_CACHE != "unprobed":
        return _BUFFERED_ONE_CACHE
    try:
        mode = pl.Buffered(1)

        def _copy(x_ref, o_ref):
            o_ref[...] = x_ref[...]

        fn = pl.pallas_call(
            _copy,
            out_shape=jax.ShapeDtypeStruct((8, 128), jnp.float32),
            grid=(2,),
            in_specs=[pl.BlockSpec((8, 128), lambda i: (0, 0), pipeline_mode=mode)],
            out_specs=pl.BlockSpec((8, 128), lambda i: (0, 0)),
        )
        jax.block_until_ready(fn(jnp.zeros((8, 128), jnp.float32)))
        _BUFFERED_ONE_CACHE = mode
    except Exception:
        _BUFFERED_ONE_CACHE = None
    return _BUFFERED_ONE_CACHE


def _vmem_limit_bytes():
    """Explicit scoped-VMEM limit, per generation (defaults are 16/32 MiB)."""
    fallback = 64 * 1024 * 1024
    try:
        cap = int(getattr(pltpu.get_tpu_info(), "vmem_capacity_bytes", fallback))
    except Exception:
        cap = fallback
    # ~54 MiB on 64 MiB parts (v7x), capped at 100 MB on 128 MiB parts (v5e/v6e)
    return int(min(cap * 0.85, 100 * 1024 * 1024))


# ---------------------------------------------------------------------------
# Deterministic synthetic parameters (shapes follow CoSTEncoder.__init__)
# ---------------------------------------------------------------------------

def init_params(key, input_dims, hidden_dims, output_dims, depth, kernels, length):
    component_dims = output_dims // 2
    keys = iter(jax.random.split(key, 64))

    def nrm(shape, scale):
        return scale * jax.random.normal(next(keys), shape, dtype=jnp.float32)

    params = {
        "fc_w": nrm((input_dims, hidden_dims), 1.0 / math.sqrt(input_dims)),
        "fc_b": nrm((1, hidden_dims), 0.02),
    }

    channels = [hidden_dims] * depth + [output_dims]
    blocks = []
    cin = hidden_dims
    for i, cout in enumerate(channels):
        final = (i == len(channels) - 1)
        blk = {
            "w1": nrm((3, cin, cout), 1.0 / math.sqrt(3 * cin)),
            "b1": nrm((1, cout), 0.02),
            "w2": nrm((3, cout, cout), 1.0 / math.sqrt(3 * cout)),
            "b2": nrm((1, cout), 0.02),
            "dilation": 2 ** i,
            "has_proj": (cin != cout) or final,
        }
        if blk["has_proj"]:
            blk["wp"] = nrm((cin, cout), 1.0 / math.sqrt(cin))
            blk["bp"] = nrm((1, cout), 0.02)
        blocks.append(blk)
        cin = cout
    params["blocks"] = blocks

    params["tfd"] = [
        {"w": nrm((k, output_dims, component_dims), 1.0 / math.sqrt(k * output_dims)),
         "b": nrm((1, component_dims), 0.02)}
        for k in kernels
    ]

    F = length // 2 + 1
    params["sfd"] = {
        "wre": nrm((F, output_dims, component_dims), 1.0 / math.sqrt(output_dims)),
        "wim": nrm((F, output_dims, component_dims), 1.0 / math.sqrt(output_dims)),
        "bre": nrm((F, component_dims), 0.02),
        "bim": nrm((F, component_dims), 0.02),
    }
    return params


# ---------------------------------------------------------------------------
# CoSTEncoder.forward (eval mode, mask='all_true', tcn_output=False)
# ---------------------------------------------------------------------------

def cost_encoder_forward(params, x, kernels, mask=None, f_chunk=256):
    B, T, Din = x.shape
    bf16 = jnp.bfloat16
    use_mask = mask is not None
    if use_mask:
        # TODO(synk): 'binomial'/'continuous' random training masks not implemented.
        mask = mask.astype(jnp.float32).reshape(B, T, 1)

    # Trend heads exactly folded -> one causal conv -> one (kmax*Co, Cc) matmul.
    wc, bc, kmax = _fold_trend_heads(params["tfd"], kernels)
    Co, Cc = wc.shape[1], wc.shape[2]
    tw = wc.reshape(kmax * Co, Cc).astype(bf16)

    # DFT bases (float64 host-side), chunked over frequencies.
    F = T // 2 + 1
    cmat, smat, are, aim = _dft_matrices(T)
    sfd = params["sfd"]
    chunks = []
    f0 = 0
    while f0 < F:
        f1 = min(F, f0 + f_chunk)
        fwd_c = jnp.asarray(np.concatenate([cmat[f0:f1], smat[f0:f1]], axis=0),
                            dtype=bf16)                          # (2*ft, T)
        inv_c = jnp.asarray(np.concatenate([are[:, f0:f1], aim[:, f0:f1]], axis=1),
                            dtype=bf16)                          # (T, 2*ft)
        chunks.append((fwd_c,
                       sfd["wre"][f0:f1], sfd["wim"][f0:f1],
                       sfd["bre"][f0:f1], sfd["bim"][f0:f1],
                       inv_c))
        f0 = f1
    n_chunks = len(chunks)

    block_meta = tuple((blk["dilation"], blk["has_proj"])
                       for blk in params["blocks"])

    buf1 = _buffered_one()

    def _const_spec(arr):
        nd = arr.ndim

        def index_map(b):
            return (0,) * nd

        if buf1 is not None:
            return pl.BlockSpec(arr.shape, index_map, pipeline_mode=buf1)
        return pl.BlockSpec(arr.shape, index_map)

    args, in_specs = [], []

    def add_const(arr):
        args.append(arr)
        in_specs.append(_const_spec(arr))

    args.append(x)
    in_specs.append(pl.BlockSpec((1, T, Din), lambda b: (b, 0, 0)))
    if use_mask:
        args.append(mask)
        in_specs.append(pl.BlockSpec((1, T, 1), lambda b: (b, 0, 0)))

    add_const(params["fc_w"].astype(bf16))
    add_const(params["fc_b"])
    for blk in params["blocks"]:
        cin, cout = blk["w1"].shape[1], blk["w1"].shape[2]
        add_const(blk["w1"].reshape(3 * cin, cout).astype(bf16))   # tap-stacked
        add_const(blk["b1"])
        add_const(blk["w2"].reshape(3 * cout, cout).astype(bf16))
        add_const(blk["b2"])
        if blk["has_proj"]:
            add_const(blk["wp"].astype(bf16))
            add_const(blk["bp"])
    add_const(tw)
    add_const(bc)
    for c in chunks:
        for arr in c:
            add_const(arr)

    kernel = functools.partial(_cost_fused_kernel, block_meta=block_meta,
                               kmax=kmax, n_chunks=n_chunks, use_mask=use_mask)

    out = pl.pallas_call(
        kernel,
        out_shape=jax.ShapeDtypeStruct((B, T, 2 * Cc), jnp.float32),
        grid=(B,),
        in_specs=in_specs,
        out_specs=pl.BlockSpec((1, T, 2 * Cc), lambda b: (b, 0, 0)),
        compiler_params=pltpu.CompilerParams(
            dimension_semantics=("parallel",),
            vmem_limit_bytes=_vmem_limit_bytes()),
    )(*args)

    trend = out[..., :Cc]
    season = out[..., Cc:]
    # TODO(synk): repr_dropout(p=0.1) is identity at inference; training dropout omitted.
    return trend, season


if __name__ == "__main__":
    B, T = 2, 16
    input_dims, hidden_dims, output_dims, depth = 4, 32, 16, 2
    kernels = (1, 2, 4)

    key = jax.random.PRNGKey(0)
    pkey, xkey = jax.random.split(key)
    params = init_params(pkey, input_dims, hidden_dims, output_dims, depth,
                         kernels, length=T)
    x = jax.random.normal(xkey, (B, T, input_dims), dtype=jnp.float32)

    trend, season = cost_encoder_forward(params, x, kernels)
    trend = jax.block_until_ready(trend)
    season = jax.block_until_ready(season)

    assert trend.shape == (B, T, output_dims // 2)
    assert season.shape == (B, T, output_dims // 2)
    assert bool(jnp.all(jnp.isfinite(trend))) and bool(jnp.all(jnp.isfinite(season)))
    print("KERNEL_OK")
</pallas_src>

<mosaic_0001>
module attributes {stable_mosaic.version = 11 : i64} {
  func.func @_copy(%arg0: i32, %arg1: memref<8x128xf32, #tpu.memory_space<vmem>>, %arg2: memref<8x128xf32, #tpu.memory_space<vmem>>) attributes {dimension_semantics = [#tpu.dimension_semantics<arbitrary>], iteration_bounds = array<i64: 2>, scalar_prefetch = 0 : i64, scratch_operands = 0 : i64, tpu.core_type = #tpu.core_type<tc>, window_params = [{pipeline_mode = #tpu.pipeline_mode<synchronous>, transform_indices = @transform_0, window_bounds = array<i64: 8, 128>}, {pipeline_mode = #tpu.pipeline_mode<synchronous>, transform_indices = @transform_1, window_bounds = array<i64: 8, 128>}]} {
    %c0 = arith.constant 0 : index
    %c0_0 = arith.constant 0 : index
    %0 = vector.load %arg1[%c0, %c0_0] : memref<8x128xf32, #tpu.memory_space<vmem>>, vector<8x128xf32>
    %c0_1 = arith.constant 0 : index
    %c0_2 = arith.constant 0 : index
    %1 = vector.load %arg2[%c0_1, %c0_2] : memref<8x128xf32, #tpu.memory_space<vmem>>, vector<8x128xf32>
    tpu.vector_store %arg2[%c0_1, %c0_2], %0 {strides = array<i32>} : memref<8x128xf32, #tpu.memory_space<vmem>>, vector<8x128xf32>,
    return
  }
  func.func @transform_0(%arg0: i32) -> (i32, i32) {
    %c0_i32 = arith.constant 0 : i32
    %c0_i32_0 = arith.constant 0 : i32
    %c0_i32_1 = arith.constant 0 : i32
    return %c0_i32, %c0_i32_0 : i32, i32
  }
  func.func @transform_1(%arg0: i32) -> (i32, i32) {
    %c0_i32 = arith.constant 0 : i32
    %c0_i32_0 = arith.constant 0 : i32
    %c0_i32_1 = arith.constant 0 : i32
    return %c0_i32, %c0_i32_0 : i32, i32
  }
}

module attributes {stable_mosaic.version = 11 : i64} {
  func.func @_cost_fused_kernel(%arg0: i32, %arg1: memref<1x16x4xf32, #tpu.memory_space<vmem>>, %arg2: memref<4x32xbf16, #tpu.memory_space<vmem>>, %arg3: memref<1x32xf32, #tpu.memory_space<vmem>>, %arg4: memref<96x32xbf16, #tpu.memory_space<vmem>>, %arg5: memref<1x32xf32, #tpu.memory_space<vmem>>, %arg6: memref<96x32xbf16, #tpu.memory_space<vmem>>, %arg7: memref<1x32xf32, #tpu.memory_space<vmem>>, %arg8: memref<96x32xbf16, #tpu.memory_space<vmem>>, %arg9: memref<1x32xf32, #tpu.memory_space<vmem>>, %arg10: memref<96x32xbf16, #tpu.memory_space<vmem>>, %arg11: memref<1x32xf32, #tpu.memory_space<vmem>>, %arg12: memref<96x16xbf16, #tpu.memory_space<vmem>>, %arg13: memref<1x16xf32, #tpu.memory_space<vmem>>, %arg14: memref<48x16xbf16, #tpu.memory_space<vmem>>, %arg15: memref<1x16xf32, #tpu.memory_space<vmem>>, %arg16: memref<32x16xbf16, #tpu.memory_space<vmem>>, %arg17: memref<1x16xf32, #tpu.memory_space<vmem>>, %arg18: memref<64x8xbf16, #tpu.memory_space<vmem>>, %arg19: memref<1x8xf32, #tpu.memory_space<vmem>>, %arg20: memref<18x16xbf16, #tpu.memory_space<vmem>>, %arg21: memref<9x16x8xf32, #tpu.memory_space<vmem>>, %arg22: memref<9x16x8xf32, #tpu.memory_space<vmem>>, %arg23: memref<9x8xf32, #tpu.memory_space<vmem>>, %arg24: memref<9x8xf32, #tpu.memory_space<vmem>>, %arg25: memref<16x18xbf16, #tpu.memory_space<vmem>>, %arg26: memref<1x16x16xf32, #tpu.memory_space<vmem>>) attributes {dimension_semantics = [#tpu.dimension_semantics<parallel>], iteration_bounds = array<i64: 2>, scalar_prefetch = 0 : i64, scratch_operands = 0 : i64, tpu.core_type = #tpu.core_type<tc>, window_params = [{transform_indices = @transform_0, window_bounds = array<i64: 1, 16, 4>}, {pipeline_mode = #tpu.pipeline_mode<synchronous>, transform_indices = @transform_1, window_bounds = array<i64: 4, 32>}, {pipeline_mode = #tpu.pipeline_mode<synchronous>, transform_indices = @transform_2, window_bounds = array<i64: 1, 32>}, {pipeline_mode = #tpu.pipeline_mode<synchronous>, transform_indices = @transform_3, window_bounds = array<i64: 96, 32>}, {pipeline_mode = #tpu.pipeline_mode<synchronous>, transform_indices = @transform_4, window_bounds = array<i64: 1, 32>}, {pipeline_mode = #tpu.pipeline_mode<synchronous>, transform_indices = @transform_5, window_bounds = array<i64: 96, 32>}, {pipeline_mode = #tpu.pipeline_mode<synchronous>, transform_indices = @transform_6, window_bounds = array<i64: 1, 32>}, {pipeline_mode = #tpu.pipeline_mode<synchronous>, transform_indices = @transform_7, window_bounds = array<i64: 96, 32>}, {pipeline_mode = #tpu.pipeline_mode<synchronous>, transform_indices = @transform_8, window_bounds = array<i64: 1, 32>}, {pipeline_mode = #tpu.pipeline_mode<synchronous>, transform_indices = @transform_9, window_bounds = array<i64: 96, 32>}, {pipeline_mode = #tpu.pipeline_mode<synchronous>, transform_indices = @transform_10, window_bounds = array<i64: 1, 32>}, {pipeline_mode = #tpu.pipeline_mode<synchronous>, transform_indices = @transform_11, window_bounds = array<i64: 96, 16>}, {pipeline_mode = #tpu.pipeline_mode<synchronous>, transform_indices = @transform_12, window_bounds = array<i64: 1, 16>}, {pipeline_mode = #tpu.pipeline_mode<synchronous>, transform_indices = @transform_13, window_bounds = array<i64: 48, 16>}, {pipeline_mode = #tpu.pipeline_mode<synchronous>, transform_indices = @transform_14, window_bounds = array<i64: 1, 16>}, {pipeline_mode = #tpu.pipeline_mode<synchronous>, transform_indices = @transform_15, window_bounds = array<i64: 32, 16>}, {pipeline_mode = #tpu.pipeline_mode<synchronous>, transform_indices = @transform_16, window_bounds = array<i64: 1, 16>}, {pipeline_mode = #tpu.pipeline_mode<synchronous>, transform_indices = @transform_17, window_bounds = array<i64: 64, 8>}, {pipeline_mode = #tpu.pipeline_mode<synchronous>, transform_indices = @transform_18, window_bounds = array<i64: 1, 8>}, {pipeline_mode = #tpu.pipeline_mode<synchronous>, transform_indices = @transform_19, window_bounds = array<i64: 18, 16>}, {pipeline_mode = #tpu.pipeline_mode<synchronous>, transform_indices = @transform_20, window_bounds = array<i64: 9, 16, 8>}, {pipeline_mode = #tpu.pipeline_mode<synchronous>, transform_indices = @transform_21, window_bounds = array<i64: 9, 16, 8>}, {pipeline_mode = #tpu.pipeline_mode<synchronous>, transform_indices = @transform_22, window_bounds = array<i64: 9, 8>}, {pipeline_mode = #tpu.pipeline_mode<synchronous>, transform_indices = @transform_23, window_bounds = array<i64: 9, 8>}, {pipeline_mode = #tpu.pipeline_mode<synchronous>, transform_indices = @transform_24, window_bounds = array<i64: 16, 18>}, {transform_indices = @transform_25, window_bounds = array<i64: 1, 16, 16>}]} {
    %c0 = arith.constant 0 : index
    %c0_0 = arith.constant 0 : index
    %c0_1 = arith.constant 0 : index
    %0 = vector.load %arg1[%c0, %c0_0, %c0_1] : memref<1x16x4xf32, #tpu.memory_space<vmem>>, vector<1x16x4xf32>
    %1 = vector.shape_cast %0 : vector<1x16x4xf32> to vector<16x4xf32>
    %2 = arith.truncf %1 : vector<16x4xf32> to vector<16x4xbf16>
    %c0_2 = arith.constant 0 : index
    %c0_3 = arith.constant 0 : index
    %3 = vector.load %arg2[%c0_2, %c0_3] : memref<4x32xbf16, #tpu.memory_space<vmem>>, vector<4x32xbf16>
    %cst = arith.constant dense<0.000000e+00> : vector<16x32xf32>
    %4 = tpu.matmul %2, %3, %cst {dimension_numbers = #tpu.dot_dimension_numbers<[1], [0], [0], [1], [0, 0, 1, 1], [], []>} : vector<16x4xbf16>, vector<4x32xbf16>, vector<16x32xf32> -> vector<16x32xf32>
    %c0_4 = arith.constant 0 : index
    %c0_5 = arith.constant 0 : index
    %5 = vector.load %arg3[%c0_4, %c0_5] : memref<1x32xf32, #tpu.memory_space<vmem>>, vector<1x32xf32>
    %6 = vector.broadcast %5 : vector<1x32xf32> to vector<16x32xf32>
    %7 = arith.addf %4, %6 : vector<16x32xf32>
    %cst_6 = arith.constant 5.000000e-01 : f32
    %8 = vector.broadcast %cst_6 : f32 to vector<16x32xf32>
    %9 = arith.mulf %8, %7 : vector<16x32xf32>
    %10 = arith.mulf %7, %7 : vector<16x32xf32>
    %11 = arith.mulf %10, %7 : vector<16x32xf32>
    %cst_7 = arith.constant 4.471500e-02 : f32
    %12 = vector.broadcast %cst_7 : f32 to vector<16x32xf32>
    %13 = arith.mulf %12, %11 : vector<16x32xf32>
    %14 = arith.addf %7, %13 : vector<16x32xf32>
    %cst_8 = arith.constant 0.797884583 : f32
    %15 = vector.broadcast %cst_8 : f32 to vector<16x32xf32>
    %16 = arith.mulf %15, %14 : vector<16x32xf32>
    %17 = math.tanh %16 : vector<16x32xf32>
    %cst_9 = arith.constant 1.000000e+00 : f32
    %18 = vector.broadcast %cst_9 : f32 to vector<16x32xf32>
    %19 = arith.addf %18, %17 : vector<16x32xf32>
    %20 = arith.mulf %9, %19 : vector<16x32xf32>
    %21 = tpu.iota {dimensions = array<i32: 0>} : vector<16x32xi32>
    %c1_i32 = arith.constant 1 : i32
    %22 = vector.broadcast %c1_i32 : i32 to vector<16x32xi32>
    %23 = arith.cmpi sge, %21, %22 : vector<16x32xi32>
    %c1_i32_10 = arith.constant 1 : i32
    %24 = tpu.dynamic_rotate %20 by %c1_i32_10 dim 0 : vector<16x32xf32>, i32 -> vector<16x32xf32>
    %cst_11 = arith.constant 0.000000e+00 : f32
    %25 = vector.broadcast %cst_11 : f32 to vector<16x32xf32>
    %26 = arith.select %23, %24, %25 : vector<16x32xi1>, vector<16x32xf32>
    %27 = tpu.iota {dimensions = array<i32: 0>} : vector<16x32xi32>
    %c15_i32 = arith.constant 15 : i32
    %28 = vector.broadcast %c15_i32 : i32 to vector<16x32xi32>
    %29 = arith.cmpi slt, %27, %28 : vector<16x32xi32>
    %c15_i32_12 = arith.constant 15 : i32
    %30 = tpu.dynamic_rotate %20 by %c15_i32_12 dim 0 : vector<16x32xf32>, i32 -> vector<16x32xf32>
    %cst_13 = arith.constant 0.000000e+00 : f32
    %31 = vector.broadcast %cst_13 : f32 to vector<16x32xf32>
    %32 = arith.select %29, %30, %31 : vector<16x32xi1>, vector<16x32xf32>
    %33 = tpu.concatenate %26, %20, %32 in 1 : vector<16x32xf32>, vector<16x32xf32>, vector<16x32xf32> -> vector<16x96xf32>
    %34 = arith.truncf %33 : vector<16x96xf32> to vector<16x96xbf16>
    %c0_14 = arith.constant 0 : index
    %c0_15 = arith.constant 0 : index
    %35 = vector.load %arg4[%c0_14, %c0_15] : memref<96x32xbf16, #tpu.memory_space<vmem>>, vector<96x32xbf16>
    %cst_16 = arith.constant dense<0.000000e+00> : vector<16x32xf32>
    %36 = tpu.matmul %34, %35, %cst_16 {dimension_numbers = #tpu.dot_dimension_numbers<[1], [0], [0], [1], [0, 0, 1, 1], [], []>} : vector<16x96xbf16>, vector<96x32xbf16>, vector<16x32xf32> -> vector<16x32xf32>
    %c0_17 = arith.constant 0 : index
    %c0_18 = arith.constant 0 : index
    %37 = vector.load %arg5[%c0_17, %c0_18] : memref<1x32xf32, #tpu.memory_space<vmem>>, vector<1x32xf32>
    %38 = vector.broadcast %37 : vector<1x32xf32> to vector<16x32xf32>
    %39 = arith.addf %36, %38 : vector<16x32xf32>
    %cst_19 = arith.constant 5.000000e-01 : f32
    %40 = vector.broadcast %cst_19 : f32 to vector<16x32xf32>
    %41 = arith.mulf %40, %39 : vector<16x32xf32>
    %42 = arith.mulf %39, %39 : vector<16x32xf32>
    %43 = arith.mulf %42, %39 : vector<16x32xf32>
    %cst_20 = arith.constant 4.471500e-02 : f32
    %44 = vector.broadcast %cst_20 : f32 to vector<16x32xf32>
    %45 = arith.mulf %44, %43 : vector<16x32xf32>
    %46 = arith.addf %39, %45 : vector<16x32xf32>
    %cst_21 = arith.constant 0.797884583 : f32
    %47 = vector.broadcast %cst_21 : f32 to vector<16x32xf32>
    %48 = arith.mulf %47, %46 : vector<16x32xf32>
    %49 = math.tanh %48 : vector<16x32xf32>
    %cst_22 = arith.constant 1.000000e+00 : f32
    %50 = vector.broadcast %cst_22 : f32 to vector<16x32xf32>
    %51 = arith.addf %50, %49 : vector<16x32xf32>
    %52 = arith.mulf %41, %51 : vector<16x32xf32>
    %53 = tpu.iota {dimensions = array<i32: 0>} : vector<16x32xi32>
    %c1_i32_23 = arith.constant 1 : i32
    %54 = vector.broadcast %c1_i32_23 : i32 to vector<16x32xi32>
    %55 = arith.cmpi sge, %53, %54 : vector<16x32xi32>
    %c1_i32_24 = arith.constant 1 : i32
    %56 = tpu.dynamic_rotate %52 by %c1_i32_24 dim 0 : vector<16x32xf32>, i32 -> vector<16x32xf32>
    %cst_25 = arith.constant 0.000000e+00 : f32
    %57 = vector.broadcast %cst_25 : f32 to vector<16x32xf32>
    %58 = arith.select %55, %56, %57 : vector<16x32xi1>, vector<16x32xf32>
    %59 = tpu.iota {dimensions = array<i32: 0>} : vector<16x32xi32>
    %c15_i32_26 = arith.constant 15 : i32
    %60 = vector.broadcast %c15_i32_26 : i32 to vector<16x32xi32>
    %61 = arith.cmpi slt, %59, %60 : vector<16x32xi32>
    %c15_i32_27 = arith.constant 15 : i32
    %62 = tpu.dynamic_rotate %52 by %c15_i32_27 dim 0 : vector<16x32xf32>, i32 -> vector<16x32xf32>
    %cst_28 = arith.constant 0.000000e+00 : f32
    %63 = vector.broadcast %cst_28 : f32 to vector<16x32xf32>
    %64 = arith.select %61, %62, %63 : vector<16x32xi1>, vector<16x32xf32>
    %65 = tpu.concatenate %58, %52, %64 in 1 : vector<16x32xf32>, vector<16x32xf32>, vector<16x32xf32> -> vector<16x96xf32>
    %66 = arith.truncf %65 : vector<16x96xf32> to vector<16x96xbf16>
    %c0_29 = arith.constant 0 : index
    %c0_30 = arith.constant 0 : index
    %67 = vector.load %arg6[%c0_29, %c0_30] : memref<96x32xbf16, #tpu.memory_space<vmem>>, vector<96x32xbf16>
    %cst_31 = arith.constant dense<0.000000e+00> : vector<16x32xf32>
    %68 = tpu.matmul %66, %67, %cst_31 {dimension_numbers = #tpu.dot_dimension_numbers<[1], [0], [0], [1], [0, 0, 1, 1], [], []>} : vector<16x96xbf16>, vector<96x32xbf16>, vector<16x32xf32> -> vector<16x32xf32>
    %c0_32 = arith.constant 0 : index
    %c0_33 = arith.constant 0 : index
    %69 = vector.load %arg7[%c0_32, %c0_33] : memref<1x32xf32, #tpu.memory_space<vmem>>, vector<1x32xf32>
    %70 = vector.broadcast %69 : vector<1x32xf32> to vector<16x32xf32>
    %71 = arith.addf %68, %70 : vector<16x32xf32>
    %72 = arith.addf %71, %7 : vector<16x32xf32>
    %cst_34 = arith.constant 5.000000e-01 : f32
    %73 = vector.broadcast %cst_34 : f32 to vector<16x32xf32>
    %74 = arith.mulf %73, %72 : vector<16x32xf32>
    %75 = arith.mulf %72, %72 : vector<16x32xf32>
    %76 = arith.mulf %75, %72 : vector<16x32xf32>
    %cst_35 = arith.constant 4.471500e-02 : f32
    %77 = vector.broadcast %cst_35 : f32 to vector<16x32xf32>
    %78 = arith.mulf %77, %76 : vector<16x32xf32>
    %79 = arith.addf %72, %78 : vector<16x32xf32>
    %cst_36 = arith.constant 0.797884583 : f32
    %80 = vector.broadcast %cst_36 : f32 to vector<16x32xf32>
    %81 = arith.mulf %80, %79 : vector<16x32xf32>
    %82 = math.tanh %81 : vector<16x32xf32>
    %cst_37 = arith.constant 1.000000e+00 : f32
    %83 = vector.broadcast %cst_37 : f32 to vector<16x32xf32>
    %84 = arith.addf %83, %82 : vector<16x32xf32>
    %85 = arith.mulf %74, %84 : vector<16x32xf32>
    %86 = tpu.iota {dimensions = array<i32: 0>} : vector<16x32xi32>
    %c2_i32 = arith.constant 2 : i32
    %87 = vector.broadcast %c2_i32 : i32 to vector<16x32xi32>
    %88 = arith.cmpi sge, %86, %87 : vector<16x32xi32>
    %c2_i32_38 = arith.constant 2 : i32
    %89 = tpu.dynamic_rotate %85 by %c2_i32_38 dim 0 : vector<16x32xf32>, i32 -> vector<16x32xf32>
    %cst_39 = arith.constant 0.000000e+00 : f32
    %90 = vector.broadcast %cst_39 : f32 to vector<16x32xf32>
    %91 = arith.select %88, %89, %90 : vector<16x32xi1>, vector<16x32xf32>
    %92 = tpu.iota {dimensions = array<i32: 0>} : vector<16x32xi32>
    %c14_i32 = arith.constant 14 : i32
    %93 = vector.broadcast %c14_i32 : i32 to vector<16x32xi32>
    %94 = arith.cmpi slt, %92, %93 : vector<16x32xi32>
    %c14_i32_40 = arith.constant 14 : i32
    %95 = tpu.dynamic_rotate %85 by %c14_i32_40 dim 0 : vector<16x32xf32>, i32 -> vector<16x32xf32>
    %cst_41 = arith.constant 0.000000e+00 : f32
    %96 = vector.broadcast %cst_41 : f32 to vector<16x32xf32>
    %97 = arith.select %94, %95, %96 : vector<16x32xi1>, vector<16x32xf32>
    %98 = tpu.concatenate %91, %85, %97 in 1 : vector<16x32xf32>, vector<16x32xf32>, vector<16x32xf32> -> vector<16x96xf32>
    %99 = arith.truncf %98 : vector<16x96xf32> to vector<16x96xbf16>
    %c0_42 = arith.constant 0 : index
    %c0_43 = arith.constant 0 : index
    %100 = vector.load %arg8[%c0_42, %c0_43] : memref<96x32xbf16, #tpu.memory_space<vmem>>, vector<96x32xbf16>
    %cst_44 = arith.constant dense<0.000000e+00> : vector<16x32xf32>
    %101 = tpu.matmul %99, %100, %cst_44 {dimension_numbers = #tpu.dot_dimension_numbers<[1], [0], [0], [1], [0, 0, 1, 1], [], []>} : vector<16x96xbf16>, vector<96x32xbf16>, vector<16x32xf32> -> vector<16x32xf32>
    %c0_45 = arith.constant 0 : index
    %c0_46 = arith.constant 0 : index
    %102 = vector.load %arg9[%c0_45, %c0_46] : memref<1x32xf32, #tpu.memory_space<vmem>>, vector<1x32xf32>
    %103 = vector.broadcast %102 : vector<1x32xf32> to vector<16x32xf32>
    %104 = arith.addf %101, %103 : vector<16x32xf32>
    %cst_47 = arith.constant 5.000000e-01 : f32
    %105 = vector.broadcast %cst_47 : f32 to vector<16x32xf32>
    %106 = arith.mulf %105, %104 : vector<16x32xf32>
    %107 = arith.mulf %104, %104 : vector<16x32xf32>
    %108 = arith.mulf %107, %104 : vector<16x32xf32>
    %cst_48 = arith.constant 4.471500e-02 : f32
    %109 = vector.broadcast %cst_48 : f32 to vector<16x32xf32>
    %110 = arith.mulf %109, %108 : vector<16x32xf32>
    %111 = arith.addf %104, %110 : vector<16x32xf32>
    %cst_49 = arith.constant 0.797884583 : f32
    %112 = vector.broadcast %cst_49 : f32 to vector<16x32xf32>
    %113 = arith.mulf %112, %111 : vector<16x32xf32>
    %114 = math.tanh %113 : vector<16x32xf32>
    %cst_50 = arith.constant 1.000000e+00 : f32
    %115 = vector.broadcast %cst_50 : f32 to vector<16x32xf32>
    %116 = arith.addf %115, %114 : vector<16x32xf32>
    %117 = arith.mulf %106, %116 : vector<16x32xf32>
    %118 = tpu.iota {dimensions = array<i32: 0>} : vector<16x32xi32>
    %c2_i32_51 = arith.constant 2 : i32
    %119 = vector.broadcast %c2_i32_51 : i32 to vector<16x32xi32>
    %120 = arith.cmpi sge, %118, %119 : vector<16x32xi32>
    %c2_i32_52 = arith.constant 2 : i32
    %121 = tpu.dynamic_rotate %117 by %c2_i32_52 dim 0 : vector<16x32xf32>, i32 -> vector<16x32xf32>
    %cst_53 = arith.constant 0.000000e+00 : f32
    %122 = vector.broadcast %cst_53 : f32 to vector<16x32xf32>
    %123 = arith.select %120, %121, %122 : vector<16x32xi1>, vector<16x32xf32>
    %124 = tpu.iota {dimensions = array<i32: 0>} : vector<16x32xi32>
    %c14_i32_54 = arith.constant 14 : i32
    %125 = vector.broadcast %c14_i32_54 : i32 to vector<16x32xi32>
    %126 = arith.cmpi slt, %124, %125 : vector<16x32xi32>
    %c14_i32_55 = arith.constant 14 : i32
    %127 = tpu.dynamic_rotate %117 by %c14_i32_55 dim 0 : vector<16x32xf32>, i32 -> vector<16x32xf32>
    %cst_56 = arith.constant 0.000000e+00 : f32
    %128 = vector.broadcast %cst_56 : f32 to vector<16x32xf32>
    %129 = arith.select %126, %127, %128 : vector<16x32xi1>, vector<16x32xf32>
    %130 = tpu.concatenate %123, %117, %129 in 1 : vector<16x32xf32>, vector<16x32xf32>, vector<16x32xf32> -> vector<16x96xf32>
    %131 = arith.truncf %130 : vector<16x96xf32> to vector<16x96xbf16>
    %c0_57 = arith.constant 0 : index
    %c0_58 = arith.constant 0 : index
    %132 = vector.load %arg10[%c0_57, %c0_58] : memref<96x32xbf16, #tpu.memory_space<vmem>>, vector<96x32xbf16>
    %cst_59 = arith.constant dense<0.000000e+00> : vector<16x32xf32>
    %133 = tpu.matmul %131, %132, %cst_59 {dimension_numbers = #tpu.dot_dimension_numbers<[1], [0], [0], [1], [0, 0, 1, 1], [], []>} : vector<16x96xbf16>, vector<96x32xbf16>, vector<16x32xf32> -> vector<16x32xf32>
    %c0_60 = arith.constant 0 : index
    %c0_61 = arith.constant 0 : index
    %134 = vector.load %arg11[%c0_60, %c0_61] : memref<1x32xf32, #tpu.memory_space<vmem>>, vector<1x32xf32>
    %135 = vector.broadcast %134 : vector<1x32xf32> to vector<16x32xf32>
    %136 = arith.addf %133, %135 : vector<16x32xf32>
    %137 = arith.addf %136, %72 : vector<16x32xf32>
    %138 = arith.truncf %137 : vector<16x32xf32> to vector<16x32xbf16>
    %c0_62 = arith.constant 0 : index
    %c0_63 = arith.constant 0 : index
    %139 = vector.load %arg16[%c0_62, %c0_63] : memref<32x16xbf16, #tpu.memory_space<vmem>>, vector<32x16xbf16>
    %cst_64 = arith.constant dense<0.000000e+00> : vector<16x16xf32>
    %140 = tpu.matmul %138, %139, %cst_64 {dimension_numbers = #tpu.dot_dimension_numbers<[1], [0], [0], [1], [0, 0, 1, 1], [], []>} : vector<16x32xbf16>, vector<32x16xbf16>, vector<16x16xf32> -> vector<16x16xf32>
    %c0_65 = arith.constant 0 : index
    %c0_66 = arith.constant 0 : index
    %141 = vector.load %arg17[%c0_65, %c0_66] : memref<1x16xf32, #tpu.memory_space<vmem>>, vector<1x16xf32>
    %142 = vector.broadcast %141 : vector<1x16xf32> to vector<16x16xf32>
    %143 = arith.addf %140, %142 : vector<16x16xf32>
    %cst_67 = arith.constant 5.000000e-01 : f32
    %144 = vector.broadcast %cst_67 : f32 to vector<16x32xf32>
    %145 = arith.mulf %144, %137 : vector<16x32xf32>
    %146 = arith.mulf %137, %137 : vector<16x32xf32>
    %147 = arith.mulf %146, %137 : vector<16x32xf32>
    %cst_68 = arith.constant 4.471500e-02 : f32
    %148 = vector.broadcast %cst_68 : f32 to vector<16x32xf32>
    %149 = arith.mulf %148, %147 : vector<16x32xf32>
    %150 = arith.addf %137, %149 : vector<16x32xf32>
    %cst_69 = arith.constant 0.797884583 : f32
    %151 = vector.broadcast %cst_69 : f32 to vector<16x32xf32>
    %152 = arith.mulf %151, %150 : vector<16x32xf32>
    %153 = math.tanh %152 : vector<16x32xf32>
    %cst_70 = arith.constant 1.000000e+00 : f32
    %154 = vector.broadcast %cst_70 : f32 to vector<16x32xf32>
    %155 = arith.addf %154, %153 : vector<16x32xf32>
    %156 = arith.mulf %145, %155 : vector<16x32xf32>
    %157 = tpu.iota {dimensions = array<i32: 0>} : vector<16x32xi32>
    %c4_i32 = arith.constant 4 : i32
    %158 = vector.broadcast %c4_i32 : i32 to vector<16x32xi32>
    %159 = arith.cmpi sge, %157, %158 : vector<16x32xi32>
    %c4_i32_71 = arith.constant 4 : i32
    %160 = tpu.dynamic_rotate %156 by %c4_i32_71 dim 0 : vector<16x32xf32>, i32 -> vector<16x32xf32>
    %cst_72 = arith.constant 0.000000e+00 : f32
    %161 = vector.broadcast %cst_72 : f32 to vector<16x32xf32>
    %162 = arith.select %159, %160, %161 : vector<16x32xi1>, vector<16x32xf32>
    %163 = tpu.iota {dimensions = array<i32: 0>} : vector<16x32xi32>
    %c12_i32 = arith.constant 12 : i32
    %164 = vector.broadcast %c12_i32 : i32 to vector<16x32xi32>
    %165 = arith.cmpi slt, %163, %164 : vector<16x32xi32>
    %c12_i32_73 = arith.constant 12 : i32
    %166 = tpu.dynamic_rotate %156 by %c12_i32_73 dim 0 : vector<16x32xf32>, i32 -> vector<16x32xf32>
    %cst_74 = arith.constant 0.000000e+00 : f32
    %167 = vector.broadcast %cst_74 : f32 to vector<16x32xf32>
    %168 = arith.select %165, %166, %167 : vector<16x32xi1>, vector<16x32xf32>
    %169 = tpu.concatenate %162, %156, %168 in 1 : vector<16x32xf32>, vector<16x32xf32>, vector<16x32xf32> -> vector<16x96xf32>
    %170 = arith.truncf %169 : vector<16x96xf32> to vector<16x96xbf16>
    %c0_75 = arith.constant 0 : index
    %c0_76 = arith.constant 0 : index
    %171 = vector.load %arg12[%c0_75, %c0_76] : memref<96x16xbf16, #tpu.memory_space<vmem>>, vector<96x16xbf16>
    %cst_77 = arith.constant dense<0.000000e+00> : vector<16x16xf32>
    %172 = tpu.matmul %170, %171, %cst_77 {dimension_numbers = #tpu.dot_dimension_numbers<[1], [0], [0], [1], [0, 0, 1, 1], [], []>} : vector<16x96xbf16>, vector<96x16xbf16>, vector<16x16xf32> -> vector<16x16xf32>
    %c0_78 = arith.constant 0 : index
    %c0_79 = arith.constant 0 : index
    %173 = vector.load %arg13[%c0_78, %c0_79] : memref<1x16xf32, #tpu.memory_space<vmem>>, vector<1x16xf32>
    %174 = vector.broadcast %173 : vector<1x16xf32> to vector<16x16xf32>
    %175 = arith.addf %172, %174 : vector<16x16xf32>
    %cst_80 = arith.constant 5.000000e-01 : f32
    %176 = vector.broadcast %cst_80 : f32 to vector<16x16xf32>
    %177 = arith.mulf %176, %175 : vector<16x16xf32>
    %178 = arith.mulf %175, %175 : vector<16x16xf32>
    %179 = arith.mulf %178, %175 : vector<16x16xf32>
    %cst_81 = arith.constant 4.471500e-02 : f32
    %180 = vector.broadcast %cst_81 : f32 to vector<16x16xf32>
    %181 = arith.mulf %180, %179 : vector<16x16xf32>
    %182 = arith.addf %175, %181 : vector<16x16xf32>
    %cst_82 = arith.constant 0.797884583 : f32
    %183 = vector.broadcast %cst_82 : f32 to vector<16x16xf32>
    %184 = arith.mulf %183, %182 : vector<16x16xf32>
    %185 = math.tanh %184 : vector<16x16xf32>
    %cst_83 = arith.constant 1.000000e+00 : f32
    %186 = vector.broadcast %cst_83 : f32 to vector<16x16xf32>
    %187 = arith.addf %186, %185 : vector<16x16xf32>
    %188 = arith.mulf %177, %187 : vector<16x16xf32>
    %189 = tpu.iota {dimensions = array<i32: 0>} : vector<16x16xi32>
    %c4_i32_84 = arith.constant 4 : i32
    %190 = vector.broadcast %c4_i32_84 : i32 to vector<16x16xi32>
    %191 = arith.cmpi sge, %189, %190 : vector<16x16xi32>
    %c4_i32_85 = arith.constant 4 : i32
    %192 = tpu.dynamic_rotate %188 by %c4_i32_85 dim 0 : vector<16x16xf32>, i32 -> vector<16x16xf32>
    %cst_86 = arith.constant 0.000000e+00 : f32
    %193 = vector.broadcast %cst_86 : f32 to vector<16x16xf32>
    %194 = arith.select %191, %192, %193 : vector<16x16xi1>, vector<16x16xf32>
    %195 = tpu.iota {dimensions = array<i32: 0>} : vector<16x16xi32>
    %c12_i32_87 = arith.constant 12 : i32
    %196 = vector.broadcast %c12_i32_87 : i32 to vector<16x16xi32>
    %197 = arith.cmpi slt, %195, %196 : vector<16x16xi32>
    %c12_i32_88 = arith.constant 12 : i32
    %198 = tpu.dynamic_rotate %188 by %c12_i32_88 dim 0 : vector<16x16xf32>, i32 -> vector<16x16xf32>
    %cst_89 = arith.constant 0.000000e+00 : f32
    %199 = vector.broadcast %cst_89 : f32 to vector<16x16xf32>
    %200 = arith.select %197, %198, %199 : vector<16x16xi1>, vector<16x16xf32>
    %201 = tpu.concatenate %194, %188, %200 in 1 : vector<16x16xf32>, vector<16x16xf32>, vector<16x16xf32> -> vector<16x48xf32>
    %202 = arith.truncf %201 : vector<16x48xf32> to vector<16x48xbf16>
    %c0_90 = arith.constant 0 : index
    %c0_91 = arith.constant 0 : index
    %203 = vector.load %arg14[%c0_90, %c0_91] : memref<48x16xbf16, #tpu.memory_space<vmem>>, vector<48x16xbf16>
    %cst_92 = arith.constant dense<0.000000e+00> : vector<16x16xf32>
    %204 = tpu.matmul %202, %203, %cst_92 {dimension_numbers = #tpu.dot_dimension_numbers<[1], [0], [0], [1], [0, 0, 1, 1], [], []>} : vector<16x48xbf16>, vector<48x16xbf16>, vector<16x16xf32> -> vector<16x16xf32>
    %c0_93 = arith.constant 0 : index
    %c0_94 = arith.constant 0 : index
    %205 = vector.load %arg15[%c0_93, %c0_94] : memref<1x16xf32, #tpu.memory_space<vmem>>, vector<1x16xf32>
    %206 = vector.broadcast %205 : vector<1x16xf32> to vector<16x16xf32>
    %207 = arith.addf %204, %206 : vector<16x16xf32>
    %208 = arith.addf %207, %143 : vector<16x16xf32>
    %209 = tpu.iota {dimensions = array<i32: 0>} : vector<16x16xi32>
    %c1_i32_95 = arith.constant 1 : i32
    %210 = vector.broadcast %c1_i32_95 : i32 to vector<16x16xi32>
    %211 = arith.cmpi sge, %209, %210 : vector<16x16xi32>
    %c1_i32_96 = arith.constant 1 : i32
    %212 = tpu.dynamic_rotate %208 by %c1_i32_96 dim 0 : vector<16x16xf32>, i32 -> vector<16x16xf32>
    %cst_97 = arith.constant 0.000000e+00 : f32
    %213 = vector.broadcast %cst_97 : f32 to vector<16x16xf32>
    %214 = arith.select %211, %212, %213 : vector<16x16xi1>, vector<16x16xf32>
    %215 = tpu.iota {dimensions = array<i32: 0>} : vector<16x16xi32>
    %c2_i32_98 = arith.constant 2 : i32
    %216 = vector.broadcast %c2_i32_98 : i32 to vector<16x16xi32>
    %217 = arith.cmpi sge, %215, %216 : vector<16x16xi32>
    %c2_i32_99 = arith.constant 2 : i32
    %218 = tpu.dynamic_rotate %208 by %c2_i32_99 dim 0 : vector<16x16xf32>, i32 -> vector<16x16xf32>
    %cst_100 = arith.constant 0.000000e+00 : f32
    %219 = vector.broadcast %cst_100 : f32 to vector<16x16xf32>
    %220 = arith.select %217, %218, %219 : vector<16x16xi1>, vector<16x16xf32>
    %221 = tpu.iota {dimensions = array<i32: 0>} : vector<16x16xi32>
    %c3_i32 = arith.constant 3 : i32
    %222 = vector.broadcast %c3_i32 : i32 to vector<16x16xi32>
    %223 = arith.cmpi sge, %221, %222 : vector<16x16xi32>
    %c3_i32_101 = arith.constant 3 : i32
    %224 = tpu.dynamic_rotate %208 by %c3_i32_101 dim 0 : vector<16x16xf32>, i32 -> vector<16x16xf32>
    %cst_102 = arith.constant 0.000000e+00 : f32
    %225 = vector.broadcast %cst_102 : f32 to vector<16x16xf32>
    %226 = arith.select %223, %224, %225 : vector<16x16xi1>, vector<16x16xf32>
    %227 = tpu.concatenate %208, %214, %220, %226 in 1 : vector<16x16xf32>, vector<16x16xf32>, vector<16x16xf32>, vector<16x16xf32> -> vector<16x64xf32>
    %228 = arith.truncf %227 : vector<16x64xf32> to vector<16x64xbf16>
    %c0_103 = arith.constant 0 : index
    %c0_104 = arith.constant 0 : index
    %229 = vector.load %arg18[%c0_103, %c0_104] : memref<64x8xbf16, #tpu.memory_space<vmem>>, vector<64x8xbf16>
    %cst_105 = arith.constant dense<0.000000e+00> : vector<16x8xf32>
    %230 = tpu.matmul %228, %229, %cst_105 {dimension_numbers = #tpu.dot_dimension_numbers<[1], [0], [0], [1], [0, 0, 1, 1], [], []>} : vector<16x64xbf16>, vector<64x8xbf16>, vector<16x8xf32> -> vector<16x8xf32>
    %c0_106 = arith.constant 0 : index
    %c0_107 = arith.constant 0 : index
    %231 = vector.load %arg19[%c0_106, %c0_107] : memref<1x8xf32, #tpu.memory_space<vmem>>, vector<1x8xf32>
    %232 = vector.broadcast %231 : vector<1x8xf32> to vector<16x8xf32>
    %233 = arith.addf %230, %232 : vector<16x8xf32>
    %234 = arith.truncf %208 : vector<16x16xf32> to vector<16x16xbf16>
    %cst_108 = arith.constant 0.000000e+00 : f32
    %235 = vector.broadcast %cst_108 : f32 to vector<16x8xf32>
    %c0_109 = arith.constant 0 : index
    %c0_110 = arith.constant 0 : index
    %236 = vector.load %arg20[%c0_109, %c0_110] : memref<18x16xbf16, #tpu.memory_space<vmem>>, vector<18x16xbf16>
    %cst_111 = arith.constant dense<0.000000e+00> : vector<18x16xf32>
    %237 = tpu.matmul %236, %234, %cst_111 {dimension_numbers = #tpu.dot_dimension_numbers<[1], [0], [0], [1], [0, 0, 1, 1], [], []>} : vector<18x16xbf16>, vector<16x16xbf16>, vector<18x16xf32> -> vector<18x16xf32>
    %238 = vector.extract_strided_slice %237 {offsets = [0, 0], sizes = [9, 16], strides = [1, 1]} : vector<18x16xf32> to vector<9x16xf32>
    %239 = vector.shape_cast %238 : vector<9x16xf32> to vector<9x16x1xf32>
    %240 = vector.extract_strided_slice %237 {offsets = [9, 0], sizes = [9, 16], strides = [1, 1]} : vector<18x16xf32> to vector<9x16xf32>
    %241 = vector.shape_cast %240 : vector<9x16xf32> to vector<9x16x1xf32>
    %c0_112 = arith.constant 0 : index
    %c0_113 = arith.constant 0 : index
    %c0_114 = arith.constant 0 : index
    %242 = vector.load %arg21[%c0_112, %c0_113, %c0_114] : memref<9x16x8xf32, #tpu.memory_space<vmem>>, vector<9x16x8xf32>
    %c0_115 = arith.constant 0 : index
    %c0_116 = arith.constant 0 : index
    %c0_117 = arith.constant 0 : index
    %243 = vector.load %arg22[%c0_115, %c0_116, %c0_117] : memref<9x16x8xf32, #tpu.memory_space<vmem>>, vector<9x16x8xf32>
    %244 = vector.broadcast %239 : vector<9x16x1xf32> to vector<9x16x8xf32>
    %245 = arith.mulf %244, %242 : vector<9x16x8xf32>
    %246 = vector.broadcast %241 : vector<9x16x1xf32> to vector<9x16x8xf32>
    %247 = arith.mulf %246, %243 : vector<9x16x8xf32>
    %248 = arith.subf %245, %247 : vector<9x16x8xf32>
    %cst_118 = arith.constant dense<0.000000e+00> : vector<9x8xf32>
    %249 = vector.multi_reduction <add>, %248, %cst_118 [1] : vector<9x16x8xf32> to vector<9x8xf32>
    %c0_119 = arith.constant 0 : index
    %c0_120 = arith.constant 0 : index
    %250 = vector.load %arg23[%c0_119, %c0_120] : memref<9x8xf32, #tpu.memory_space<vmem>>, vector<9x8xf32>
    %251 = arith.addf %249, %250 : vector<9x8xf32>
    %252 = vector.broadcast %239 : vector<9x16x1xf32> to vector<9x16x8xf32>
    %253 = arith.mulf %252, %243 : vector<9x16x8xf32>
    %254 = vector.broadcast %241 : vector<9x16x1xf32> to vector<9x16x8xf32>
    %255 = arith.mulf %254, %242 : vector<9x16x8xf32>
    %256 = arith.addf %253, %255 : vector<9x16x8xf32>
    %cst_121 = arith.constant dense<0.000000e+00> : vector<9x8xf32>
    %257 = vector.multi_reduction <add>, %256, %cst_121 [1] : vector<9x16x8xf32> to vector<9x8xf32>
    %c0_122 = arith.constant 0 : index
    %c0_123 = arith.constant 0 : index
    %258 = vector.load %arg24[%c0_122, %c0_123] : memref<9x8xf32, #tpu.memory_space<vmem>>, vector<9x8xf32>
    %259 = arith.addf %257, %258 : vector<9x8xf32>
    %260 = tpu.concatenate %251, %259 in 0 : vector<9x8xf32>, vector<9x8xf32> -> vector<18x8xf32>
    %261 = arith.truncf %260 : vector<18x8xf32> to vector<18x8xbf16>
    %c0_124 = arith.constant 0 : index
    %c0_125 = arith.constant 0 : index
    %262 = vector.load %arg25[%c0_124, %c0_125] : memref<16x18xbf16, #tpu.memory_space<vmem>>, vector<16x18xbf16>
    %cst_126 = arith.constant dense<0.000000e+00> : vector<16x8xf32>
    %263 = tpu.matmul %262, %261, %cst_126 {dimension_numbers = #tpu.dot_dimension_numbers<[1], [0], [0], [1], [0, 0, 1, 1], [], []>} : vector<16x18xbf16>, vector<18x8xbf16>, vector<16x8xf32> -> vector<16x8xf32>
    %264 = arith.addf %235, %263 : vector<16x8xf32>
    %265 = tpu.concatenate %233, %264 in 1 : vector<16x8xf32>, vector<16x8xf32> -> vector<16x16xf32>
    %c0_127 = arith.constant 0 : index
    %c0_128 = arith.constant 0 : index
    %c0_129 = arith.constant 0 : index
    %266 = vector.load %arg26[%c0_127, %c0_128, %c0_129] : memref<1x16x16xf32, #tpu.memory_space<vmem>>, vector<1x16x16xf32>
    %267 = vector.shape_cast %266 : vector<1x16x16xf32> to vector<16x16xf32>
    %268 = vector.shape_cast %265 : vector<16x16xf32> to vector<1x16x16xf32>
    tpu.vector_store %arg26[%c0_127, %c0_128, %c0_129], %268 {strides = array<i32>} : memref<1x16x16xf32, #tpu.memory_space<vmem>>, vector<1x16x16xf32>,
    return
  }
  func.func @transform_0(%arg0: i32) -> (i32, i32, i32) {
    %c0_i32 = arith.constant 0 : i32
    %c0_i32_0 = arith.constant 0 : i32
    %c0_i32_1 = arith.constant 0 : i32
    return %arg0, %c0_i32, %c0_i32_0 : i32, i32, i32
  }
  func.func @transform_1(%arg0: i32) -> (i32, i32) {
    %c0_i32 = arith.constant 0 : i32
    %c0_i32_0 = arith.constant 0 : i32
    %c0_i32_1 = arith.constant 0 : i32
    return %c0_i32, %c0_i32_0 : i32, i32
  }
  func.func @transform_2(%arg0: i32) -> (i32, i32) {
    %c0_i32 = arith.constant 0 : i32
    %c0_i32_0 = arith.constant 0 : i32
    %c0_i32_1 = arith.constant 0 : i32
    return %c0_i32, %c0_i32_0 : i32, i32
  }
  func.func @transform_3(%arg0: i32) -> (i32, i32) {
    %c0_i32 = arith.constant 0 : i32
    %c0_i32_0 = arith.constant 0 : i32
    %c0_i32_1 = arith.constant 0 : i32
    return %c0_i32, %c0_i32_0 : i32, i32
  }
  func.func @transform_4(%arg0: i32) -> (i32, i32) {
    %c0_i32 = arith.constant 0 : i32
    %c0_i32_0 = arith.constant 0 : i32
    %c0_i32_1 = arith.constant 0 : i32
    return %c0_i32, %c0_i32_0 : i32, i32
  }
  func.func @transform_5(%arg0: i32) -> (i32, i32) {
    %c0_i32 = arith.constant 0 : i32
    %c0_i32_0 = arith.constant 0 : i32
    %c0_i32_1 = arith.constant 0 : i32
    return %c0_i32, %c0_i32_0 : i32, i32
  }
  func.func @transform_6(%arg0: i32) -> (i32, i32) {
    %c0_i32 = arith.constant 0 : i32
    %c0_i32_0 = arith.constant 0 : i32
    %c0_i32_1 = arith.constant 0 : i32
    return %c0_i32, %c0_i32_0 : i32, i32
  }
  func.func @transform_7(%arg0: i32) -> (i32, i32) {
    %c0_i32 = arith.constant 0 : i32
    %c0_i32_0 = arith.constant 0 : i32
    %c0_i32_1 = arith.constant 0 : i32
    return %c0_i32, %c0_i32_0 : i32, i32
  }
  func.func @transform_8(%arg0: i32) -> (i32, i32) {
    %c0_i32 = arith.constant 0 : i32
    %c0_i32_0 = arith.constant 0 : i32
    %c0_i32_1 = arith.constant 0 : i32
    return %c0_i32, %c0_i32_0 : i32, i32
  }
  func.func @transform_9(%arg0: i32) -> (i32, i32) {
    %c0_i32 = arith.constant 0 : i32
    %c0_i32_0 = arith.constant 0 : i32
    %c0_i32_1 = arith.constant 0 : i32
    return %c0_i32, %c0_i32_0 : i32, i32
  }
  func.func @transform_10(%arg0: i32) -> (i32, i32) {
    %c0_i32 = arith.constant 0 : i32
    %c0_i32_0 = arith.constant 0 : i32
    %c0_i32_1 = arith.constant 0 : i32
    return %c0_i32, %c0_i32_0 : i32, i32
  }
  func.func @transform_11(%arg0: i32) -> (i32, i32) {
    %c0_i32 = arith.constant 0 : i32
    %c0_i32_0 = arith.constant 0 : i32
    %c0_i32_1 = arith.constant 0 : i32
    return %c0_i32, %c0_i32_0 : i32, i32
  }
  func.func @transform_12(%arg0: i32) -> (i32, i32) {
    %c0_i32 = arith.constant 0 : i32
    %c0_i32_0 = arith.constant 0 : i32
    %c0_i32_1 = arith.constant 0 : i32
    return %c0_i32, %c0_i32_0 : i32, i32
  }
  func.func @transform_13(%arg0: i32) -> (i32, i32) {
    %c0_i32 = arith.constant 0 : i32
    %c0_i32_0 = arith.constant 0 : i32
    %c0_i32_1 = arith.constant 0 : i32
    return %c0_i32, %c0_i32_0 : i32, i32
  }
  func.func @transform_14(%arg0: i32) -> (i32, i32) {
    %c0_i32 = arith.constant 0 : i32
    %c0_i32_0 = arith.constant 0 : i32
    %c0_i32_1 = arith.constant 0 : i32
    return %c0_i32, %c0_i32_0 : i32, i32
  }
  func.func @transform_15(%arg0: i32) -> (i32, i32) {
    %c0_i32 = arith.constant 0 : i32
    %c0_i32_0 = arith.constant 0 : i32
    %c0_i32_1 = arith.constant 0 : i32
    return %c0_i32, %c0_i32_0 : i32, i32
  }
  func.func @transform_16(%arg0: i32) -> (i32, i32) {
    %c0_i32 = arith.constant 0 : i32
    %c0_i32_0 = arith.constant 0 : i32
    %c0_i32_1 = arith.constant 0 : i32
    return %c0_i32, %c0_i32_0 : i32, i32
  }
  func.func @transform_17(%arg0: i32) -> (i32, i32) {
    %c0_i32 = arith.constant 0 : i32
    %c0_i32_0 = arith.constant 0 : i32
    %c0_i32_1 = arith.constant 0 : i32
    return %c0_i32, %c0_i32_0 : i32, i32
  }
  func.func @transform_18(%arg0: i32) -> (i32, i32) {
    %c0_i32 = arith.constant 0 : i32
    %c0_i32_0 = arith.constant 0 : i32
    %c0_i32_1 = arith.constant 0 : i32
    return %c0_i32, %c0_i32_0 : i32, i32
  }
  func.func @transform_19(%arg0: i32) -> (i32, i32) {
    %c0_i32 = arith.constant 0 : i32
    %c0_i32_0 = arith.constant 0 : i32
    %c0_i32_1 = arith.constant 0 : i32
    return %c0_i32, %c0_i32_0 : i32, i32
  }
  func.func @transform_20(%arg0: i32) -> (i32, i32, i32) {
    %c0_i32 = arith.constant 0 : i32
    %c0_i32_0 = arith.constant 0 : i32
    %c0_i32_1 = arith.constant 0 : i32
    %c0_i32_2 = arith.constant 0 : i32
    return %c0_i32, %c0_i32_0, %c0_i32_1 : i32, i32, i32
  }
  func.func @transform_21(%arg0: i32) -> (i32, i32, i32) {
    %c0_i32 = arith.constant 0 : i32
    %c0_i32_0 = arith.constant 0 : i32
    %c0_i32_1 = arith.constant 0 : i32
    %c0_i32_2 = arith.constant 0 : i32
    return %c0_i32, %c0_i32_0, %c0_i32_1 : i32, i32, i32
  }
  func.func @transform_22(%arg0: i32) -> (i32, i32) {
    %c0_i32 = arith.constant 0 : i32
    %c0_i32_0 = arith.constant 0 : i32
    %c0_i32_1 = arith.constant 0 : i32
    return %c0_i32, %c0_i32_0 : i32, i32
  }
  func.func @transform_23(%arg0: i32) -> (i32, i32) {
    %c0_i32 = arith.constant 0 : i32
    %c0_i32_0 = arith.constant 0 : i32
    %c0_i32_1 = arith.constant 0 : i32
    return %c0_i32, %c0_i32_0 : i32, i32
  }
  func.func @transform_24(%arg0: i32) -> (i32, i32) {
    %c0_i32 = arith.constant 0 : i32
    %c0_i32_0 = arith.constant 0 : i32
    %c0_i32_1 = arith.constant 0 : i32
    return %c0_i32, %c0_i32_0 : i32, i32
  }
  func.func @transform_25(%arg0: i32) -> (i32, i32, i32) {
    %c0_i32 = arith.constant 0 : i32
    %c0_i32_0 = arith.constant 0 : i32
    %c0_i32_1 = arith.constant 0 : i32
    return %arg0, %c0_i32, %c0_i32_0 : i32, i32, i32
  }
}

</mosaic_0001>

<bundles_post_ra>
// kernel: tpu_custom_call.1
= control target key start
LH: loop header
LB: loop body
LE: loop exit
PB: predicated region body
PF: predicated region fallthrough
CT: control target
= control target key end

     0   :  { %6 = vsyncpa [#allocation3], 0  ;;  %s286_s0 = inlined_call_operand.hbm [shape: f32[8,128], index: 0, kind: input, shape index: {}]   ;;  %s287_s1 = inlined_call_operand.hbm [shape: f32[8,128], index: 1, kind: output, shape index: {}]  }
   0x1   :  { %7 = vsyncpa [#allocation4], 0  ;;  %s269_s6 = smov 0  }
   0x2 LB: > { %s148_s7 = sadd.s32 4294967295, %s255_s6   ;;  %p149_p0 = scmp.ge.s32.totalorder %s255_s6, 1  ;;  %s255_s6 = sphi %s269_s6, %s13_s6  }
   0x3   : > { %p60_p1 = scmp.lt.s32.totalorder %s255_s6, 3  ;;  %s72_s10 = sshll.u32 %s286_s0, 4  ;;  %s73_s10 = int_to_ptr.hbm [resolvable:$true] %s72_s10 }
   0x4   : > { %p169_p3 = scmp.eq.s32.totalorder %s148_s7, 0  ;;  %s257_s11 = smov [#allocation2]  }
   0x5   : > { %p61_p2 = pnand %p149_p0, %p60_p1  ;;  %s74_s12 = sshll.u32 %s257_s11, 4  ;;  %s75_s12 = int_to_ptr.vmem [resolvable:$true] %s74_s12 }
   0x7   : > { %p165_p4 = pneg %p61_p2  ;;  %87 = sbr.rel (%p61_p2) target bundleno = 19 (0x13), region = 24 }
   0x9   : > { %p166_p5 = pnand %p169_p3, %p165_p4 }
   0xb   : > { %168 = dma.hbm_to_vmem [thread:$0]  (!%p166_p5), %s73_s10, 128, %s75_s12, [#allocation3]  }
   0xc   : > { %246 = dma.done.wait (%p169_p3), [#allocation3], 128  }
   0xd   : > { %248 = vsyncadd (%p169_p3), [#allocation3], 4294967168  ;;  %s258_s13 = smov [#allocation5]   ;;  %s108_s17 = sshll.u32 %s287_s1, 4  ;;  %v98_v0 = vld [vmem:[#allocation2] sm:$0xff]  ;;  %s109_s17 = int_to_ptr.hbm [resolvable:$true] %s108_s17 }
   0xe   : > { %s106_s14 = sshll.u32 %s258_s13, 4  ;;  %p171_p6 = scmp.eq.s32.totalorder %s148_s7, 1  ;;  %99 = vst [vmem:[#allocation5] sm:$0xff] %v98_v0  ;;  %s107_s14 = int_to_ptr.vmem [resolvable:$true] %s106_s14 }
  0x10   : > { %162 = dma.vmem_to_hbm [thread:$0]  (%p171_p6), %s107_s14, 128, %s109_s17, [#allocation4]  }
  0x11   : > { %250 = dma.done.wait (%p171_p6), [#allocation4], 128  }
  0x12   : > { %252 = vsyncadd (%p171_p6), [#allocation4], 4294967168 }
  0x13 PF: > { %s13_s6 = sadd.s32 1, %s255_s6  }
  0x14   : > { %p10_p7 = scmp.ge.s32.totalorder %s13_s6, 4  }
  0x16   :  { %12 = sbr.rel (!%p10_p7) target bundleno = 2 (0x2), region = 53 }
  0x1b   :  { %122 = vsyncpa [#allocation3], 1 }
  0x1c   :  { %124 = vsyncpa [#allocation3 + $0x1], 1 }
  0x1d   :  { %125 = vsyncpa [#allocation4], 1 }
  0x1e   :  { %127 = vsyncpa [#allocation4 + $0x1], 1 }

// kernel: tpu_custom_call.1
= control target key start
LH: loop header
LB: loop body
LE: loop exit
PB: predicated region body
PF: predicated region fallthrough
CT: control target
= control target key end

     0   :  { %s3871_s0 = inlined_call_operand.vmem [shape: f32[2,16,4], index: 0, kind: input, shape index: {}]   ;;  %s3872_s1 = inlined_call_operand.vmem [shape: bf16[4,32], index: 1, kind: input, shape index: {}]   ;;  %s3873_s2 = inlined_call_operand.vmem [shape: f32[1,32], index: 2, kind: input, shape index: {}]   ;;  %s3874_s3 = inlined_call_operand.vmem [shape: bf16[96,32], index: 3, kind: input, shape index: {}]   ;;  %s3875_s4 = inlined_call_operand.vmem [shape: f32[1,32], index: 4, kind: input, shape index: {}]   ;;  %s3876_s5 = inlined_call_operand.vmem [shape: bf16[96,32], index: 5, kind: input, shape index: {}]   ;;  %s3877_s6 = inlined_call_operand.vmem [shape: f32[1,32], index: 6, kind: input, shape index: {}]   ;;  %s3878_s7 = inlined_call_operand.vmem [shape: bf16[96,32], index: 7, kind: input, shape index: {}]   ;;  %s3879_s8 = inlined_call_operand.vmem [shape: f32[1,32], index: 8, kind: input, shape index: {}]   ;;  %s3880_s9 = inlined_call_operand.vmem [shape: bf16[96,32], index: 9, kind: input, shape index: {}]   ;;  %s3881_s10 = inlined_call_operand.vmem [shape: f32[1,32], index: 10, kind: input, shape index: {}]   ;;  %s3882_s11 = inlined_call_operand.vmem [shape: bf16[96,16], index: 11, kind: input, shape index: {}]   ;;  %s3883_s12 = inlined_call_operand.vmem [shape: f32[1,16], index: 12, kind: input, shape index: {}]   ;;  %s3884_s13 = inlined_call_operand.vmem [shape: bf16[48,16], index: 13, kind: input, shape index: {}]   ;;  %s3885_s14 = inlined_call_operand.vmem [shape: f32[1,16], index: 14, kind: input, shape index: {}]   ;;  %s3886_s15 = inlined_call_operand.vmem [shape: bf16[32,16], index: 15, kind: input, shape index: {}]   ;;  %s3887_s16 = inlined_call_operand.vmem [shape: f32[1,16], index: 16, kind: input, shape index: {}]   ;;  %s3888_s17 = inlined_call_operand.vmem [shape: bf16[64,8], index: 17, kind: input, shape index: {}]   ;;  %s3889_s18 = inlined_call_operand.vmem [shape: f32[1,8], index: 18, kind: input, shape index: {}]   ;;  %s3890_s19 = inlined_call_operand.vmem [shape: bf16[18,16], index: 19, kind: input, shape index: {}]   ;;  %s3891_s20 = inlined_call_operand.vmem [shape: f32[9,16,8], index: 20, kind: input, shape index: {}]   ;;  %s3892_s21 = inlined_call_operand.vmem [shape: f32[9,16,8], index: 21, kind: input, shape index: {}]   ;;  %s3893_s22 = inlined_call_operand.vmem [shape: f32[9,8], index: 22, kind: input, shape index: {}]   ;;  %s3894_s23 = inlined_call_operand.vmem [shape: f32[9,8], index: 23, kind: input, shape index: {}]   ;;  %s3895_s24 = inlined_call_operand.vmem [shape: bf16[16,18], index: 24, kind: input, shape index: {}]   ;;  %s3896_s25 = inlined_call_operand.hbm [shape: f32[2,16,16], index: 25, kind: output, shape index: {}]  }
   0x1   :  { %3913 = sst [smem:[#allocation9_spill]] %s3871_s0 }
   0x2   :  { %3914 = sst [smem:[#allocation10_spill]] %s3872_s1 }
   0x3   :  { %3915 = sst [smem:[#allocation11_spill]] %s3873_s2 }
   0x4   :  { %3916 = sst [smem:[#allocation12_spill]] %s3874_s3 }
   0x5   :  { %3917 = sst [smem:[#allocation13_spill]] %s3875_s4 }
   0x6   :  { %3918 = sst [smem:[#allocation14_spill]] %s3876_s5 }
   0x7   :  { %3919 = sst [smem:[#allocation15_spill]] %s3877_s6 }
   0x8   :  { %3920 = sst [smem:[#allocation16_spill]] %s3878_s7 }
   0x9   :  { %3921 = sst [smem:[#allocation17_spill]] %s3879_s8 }
   0xa   :  { %3922 = sst [smem:[#allocation18_spill]] %s3880_s9 }
   0xb   :  { %3923 = sst [smem:[#allocation19_spill]] %s3881_s10 }
   0xc   :  { %3924 = sst [smem:[#allocation20_spill]] %s3882_s11 }
   0xd   :  { %3925 = sst [smem:[#allocation21_spill]] %s3886_s15 }
   0xe   :  { %30 = vsyncpa [#allocation3], 0 }
   0xf   :  { %32 = vsyncpa [#allocation3 + $0x1], 0  ;;  %s3081_s29 = smov 0   ;;  %s3083_s2 = smov 0  }
  0x10   :  { %s3085_s6 = smov 0   ;;  %s3087_s30 = smov 0  }
  0x11 LB: > { %3926 = sst [smem:[#allocation5_spill]] %s2939_s6  ;;  %s3102_s7 = sadd.s32 4294967295, %s2943_s30   ;;  %s2943_s30 = sphi %s3087_s30, %s3949_s30   ;;  %s2939_s6 = sphi %s3085_s6, %s3951_s6   ;;  %s2935_s2 = sphi %s3083_s2, %s3953_s2   ;;  %s2931_s29 = sphi %s3081_s29, %s3952_s29  }
  0x12   : > { %s2471_s3 = sadd.s32 4294967294, %s2943_s30   ;;  %s3106_s26 = sadd.s32 1, %s2943_s30  }
  0x13   : > { %3927 = sst [smem:[#allocation6_spill]] %s3106_s26  ;;  %s575_s1 = sadd.s32 1, %s2939_s6 }
  0x14   : > { %s572_s8 = ssub.s32 %s2943_s30, %s3106_s26  ;;  %p585_p0 = scmp.ne.s32.totalorder %s2939_s6, %s2935_s2 }
  0x15   : > { %p573_p1 = scmp.eq.s32.totalorder %s572_s8, 0  ;;  %p586_p2 = scmp.eq.s32.totalorder %s3102_s7, 1 }
  0x16   : > { %p591_p3 = scmp.ne.s32.totalorder %s2935_s2, %s2931_s29  ;;  %p592_p4 = scmp.eq.s32.totalorder %s2471_s3, 1 }
  0x17   : > { %s3117_s27 = scalar_select %p573_p1, %s2939_s6, %s575_s1  }
  0x18   : > { %p3119_p5 = por %p586_p2, %p585_p0  ;;  %p3123_p6 = por %p592_p4, %p591_p3 }
  0x19   : > { %3928 = sst [smem:[#allocation7_spill]] %s3117_s27  ;;  %p2474_p7 = scmp.ge.s32.totalorder %s2943_s30, 1 }
  0x1a   : > { %s3930_s28 = scalar_select %p3123_p6, 1, 0 }
  0x1b   : > { %p690_p8 = scmp.lt.s32.totalorder %s2943_s30, 3 }
  0x1c   : > { %3931 = sst [smem:[#allocation8_spill]] %s3930_s28 }
  0x1d   : > { %p691_p9 = pnand %p2474_p7, %p690_p8 }
  0x1e   : > { %s3932_s0 = sld [smem:[#allocation10_spill]] (!%p691_p9)  ;;  %p758_p10 = scmp.lt.s32.totalorder (!%p691_p9), %s3102_s7, 1 }
  0x1f   : > { %694 = sbr.rel (%p691_p9) target bundleno = 2604 (0xa2c), region = 120  ;;  %s3933_s6 = sld [smem:[#allocation9_spill]] (!%p691_p9) }
  0x20   : > { %s3934_s28 = sld [smem:[#allocation11_spill]] (!%p691_p9)  ;;  %s3907_s8 = smov (!%p691_p9), 32  }
  0x21   : > { %s3935_s27 = sld [smem:[#allocation12_spill]] (!%p691_p9)  ;;  %s3905_s9 = smov (!%p691_p9), 64  }
  0x22   : > { %s3940_s5 = sld [smem:[#allocation16_spill]] (!%p691_p9) }
  0x23   : > { %s3944_s15 = sld [smem:[#allocation21_spill]] (!%p691_p9) }
  0x24   : > { %v767_v0 = vld [vmem:[%s3932_s0] sm:$0x3]  ;;  %vm776_vm0 = vcmask 1041408   ;;  %s759_s3 = scalar_select %p758_p10, %s3102_s7, 1  ;;  %vm772_vm1 = vcmask 31744   ;;  %v812_v5 = vlaneseq  ;;  %vm849_vm6 = vcmask 261120  }
  0x25   : > { %v778_v1 = vsel %vm776_vm0, %v767_v0, 0  ;;  %vm852_vm7 = vcmask 523264   ;;  %vm908_vm8 = vcmask 785408   ;;  %s3937_s0 = sld [smem:[#allocation14_spill]]  ;;  %vm1497_vm0 = vcmask 130048  }
  0x26   : > { %787 = vmatpush.bf16.msra.mxu2 %v778_v1  ;;  %s2659_s1 = sshll.u32 %s759_s3, 4  ;;  %v2848_v6 = vld [vmem:[%s3934_s28] ss:$0 sm:$0xff]  ;;  %v3140_v7 = vshrl.u32 %v812_v5, 7  ;;  %s3939_s28 = sld [smem:[#allocation15_spill]] }
  0x27   : > { %s762_s26 = scalar_lea.vmem %s3933_s6, %s2659_s1  ;;  %v2665_v17 = vld [vmem:[%s3935_s27 + $0x28] sm:$0xff]  ;;  %v2664_v20 = vld [vmem:[%s3935_s27 + $0x20] sm:$0xff]  ;;  %v2663_v23 = vld [vmem:[%s3935_s27 + $0x18] sm:$0xff]  ;;  %s3936_s6 = sld [smem:[#allocation13_spill]] }
  0x28   : > { %v764_v2 = vld [vmem:[%s762_s26] sm:$0xff]  ;;  %v765_v3 = vld [vmem:[%s762_s26 + $0x8] sm:$0xff]  ;;  %v3143_v9 = vadd.s32 8, %v3140_v7  ;;  %2809 = vset.pattern.permute.xlu2 %v3140_v7  ;;  %2807 = vset.pattern.permute.xlu0 %v3140_v7  ;;  %vm828_vm2 = vcmp.lt.s32.totalorder %v3140_v7, 7  ;;  %vm819_vm3 = vcmp.lt.s32.totalorder %v3140_v7, 1  ;;  %v2662_v45 = vld [vmem:[%s3935_s27 + $0x10] sm:$0xff] }
  0x29   : > { %v766_v4 = vpack.c.bf16 %v765_v3, %v764_v2  ;;  %914 = vmatpush.bf16.msra.mxu1 %v2665_v17  ;;  %v2661_v46 = vld [vmem:[%s3935_s27 + $0x8] sm:$0xff]  ;;  %v2660_v47 = vld [vmem:[%s3935_s27] sm:$0xff]  ;;  %vm815_vm5 = vcmp.ge.s32.totalorder %v3140_v7, 1  ;;  %vm1079_vm9 = vcmp.lt.s32.totalorder %v3140_v7, 6  ;;  %vm1070_vm10 = vcmp.lt.s32.totalorder %v3140_v7, 2  ;;  %s3942_s1 = sld [smem:[#allocation17_spill]] }
  0x2a   : > { %2808 = vset.pattern.permute.xlu1 %v3143_v9  ;;  %vm825_vm4 = vcmp.lt.s32.totalorder %v3143_v9, 15  ;;  %vm1076_vm11 = vcmp.lt.s32.totalorder %v3143_v9, 14  ;;  %vm1066_vm12 = vcmp.ge.s32.totalorder %v3140_v7, 2  ;;  %s3945_s10 = sld [smem:[#allocation19_spill]]  ;;  %vm1356_vm13 = vcmp.lt.s32.totalorder %v3140_v7, 4  ;;  %s755_s27 = sand.u32 1, %s2935_s2  }
  0x2b   : > { %2478 = vmatmul.msk.bf16.vlgmr.msra.gmra.mxu2 %vm772_vm1, %v766_v4  ;;  %v2671_v5 = vld [vmem:[%s3937_s0 + $0x28] sm:$0xff]  ;;  %vm1362_vm14 = vcmp.lt.s32.totalorder %v3143_v9, 12  ;;  %s3946_s11 = sld [smem:[#allocation20_spill]]  ;;  %vm1352_vm15 = vcmp.ge.s32.totalorder %v3140_v7, 4  ;;  %vm1531_vm1 = vcmask 392192   ;;  %s2475_s26 = sshll.u32 %s755_s27, 4 }
  0x2c   : > { %1034 = vmatpush.bf16.msrb.mxu2 %v2671_v5 }
  0x2d   : > { %915 = vmatpush.bf16.msra.mxu1 %v2664_v20  ;;  %v2849_v60 = vld [vmem:[%s3936_s6] ss:$0 sm:$0xff]  ;;  %s3912_s6 = smov 8  }
  0x31   : > { %916 = vmatpush.bf16.msra.mxu1 %v2663_v23 }
  0x35   : > { %917 = vmatpush.bf16.msra.mxu1 %v2662_v45 }
  0x39   : > { %918 = vmatpush.bf16.msra.mxu1 %v2661_v46 }
  0x3d   : > { %919 = vmatpush.bf16.msra.mxu1 %v2660_v47 }
  0xae   : > { %v789_v8 = vpop.f32.mrf.mxu2 }
  0xaf   : > { %v3147_v10 = vadd.f32 %v2848_v6, %v789_v8 }
  0xb1   : > { %v796_v11 = vmul.f32 %v3147_v10, %v3147_v10  ;;  %v794_v28 = vmul.f32 0.5, %v3147_v10 }
  0xb3   : > { %v798_v12 = vmul.f32 %v796_v11, %v3147_v10  ;;  %v2670_v11 = vld [vmem:[%s3937_s0 + $0x20] sm:$0xff] }
  0xb4   : > { %1035 = vmatpush.bf16.msrb.mxu2 %v2670_v11 }
  0xb5   : > { %v800_v13 = vmul.f32 0.044715, %v798_v12 }
  0xb6   : > { %v791_v14 = vpop.f32.mrf.mxu2 }
  0xb7   : > { %v3153_v15 = vadd.f32 %v2848_v6, %v791_v14  ;;  %v802_v16 = vadd.f32 %v800_v13, %v3147_v10  ;;  %v2669_v14 = vld [vmem:[%s3937_s0 + $0x18] sm:$0xff] }
  0xb8   : > { %1036 = vmatpush.bf16.msrb.mxu2 %v2669_v14 }
  0xb9   : > { %v797_v18 = vmul.f32 %v3153_v15, %v3153_v15  ;;  %v804_v19 = vmul.f32 0.7978846, %v802_v16  ;;  %v795_v31 = vmul.f32 0.5, %v3153_v15 }
  0xbb   : > { %v799_v21 = vmul.f32 %v797_v18, %v3153_v15  ;;  %2857 = vtanh.f32 %v804_v19 }
  0xbd   : > { %v801_v22 = vmul.f32 0.044715, %v799_v21 }
  0xbf   : > { %v803_v24 = vadd.f32 %v801_v22, %v3153_v15 }
  0xc1   : > { %v805_v25 = vmul.f32 0.7978846, %v803_v24  ;;  %v2858_v26 = vpop.eup %2857 }
  0xc2   : > { %v808_v27 = vadd.f32 1.0, %v2858_v26 }
  0xc3   : > { %2859 = vtanh.f32 %v805_v25 }
  0xc4   : > { %v810_v30 = vmul.f32 %v808_v27, %v794_v28 }
  0xc6   : > { %v817_v34 = vrot.slane %v810_v30, 7  ;;  %v826_v37 = vrot.slane %v810_v30, 1 }
  0xc9   : > { %v2860_v29 = vpop.eup %2859 }
  0xca   : > { %v809_v32 = vadd.f32 1.0, %v2860_v29 }
  0xcc   : > { %v811_v33 = vmul.f32 %v809_v32, %v795_v31 }
  0xce   : > { %v818_v35 = vrot.slane %v811_v33, 7  ;;  %v2747_v36 = vpack.i.bf16 %v811_v33, %v810_v30  ;;  %v827_v38 = vrot.slane %v811_v33, 1 }
  0xd0   : > { %2748 = vrot.lane.b32.xlu0 %v2747_v36, %s3907_s8  ;;  %v830_v39 = vsel %vm828_vm2, %v827_v38, %v826_v37  ;;  %v820_v40 = vsel %vm819_vm3, %v817_v34, %v818_v35  ;;  %v821_v41 = vsel %vm819_vm3, %v818_v35, %v817_v34  ;;  %v829_v42 = vsel %vm828_vm2, %v826_v37, %v827_v38  ;;  %v2668_v37 = vld [vmem:[%s3937_s0 + $0x10] sm:$0xff]  ;;  %v2667_v38 = vld [vmem:[%s3937_s0 + $0x8] sm:$0xff] }
  0xd1   : > { %v832_v43 = vsel %vm825_vm4, %v830_v39, 0.0  ;;  %v822_v52 = vsel %vm815_vm5, %v821_v41, 0.0  ;;  %1037 = vmatpush.bf16.msrb.mxu2 %v2668_v37  ;;  %v2666_v39 = vld [vmem:[%s3937_s0] sm:$0xff]  ;;  %s2901_s0 = scalar_lea.hbm %s3896_s25, 32 }
  0xd2   : > { %v2752_v44 = vpack.i.bf16 %v832_v43, %v829_v42 }
  0xd5   : > { %1038 = vmatpush.bf16.msrb.mxu2 %v2667_v38 }
  0xd8   : > { %2753 = vrot.lane.b32.xlu0 %v2752_v44, %s3905_s9  ;;  %s3938_s9 = smov 64  }
  0xd9   : > { %1039 = vmatpush.bf16.msrb.mxu2 %v2666_v39 }
 0x142   : > { %v2749_v48 = vpop.permute.xlu0 %2748 }
 0x143   : > { %v2751_v49 = vunpack.i.h.bf16 %v2749_v48  ;;  %v2750_v50 = vunpack.i.l.bf16 %v2749_v48 }
 0x145   : > { %v850_v55 = vsel %vm849_vm6, %v822_v52, %v2750_v50  ;;  %v851_v56 = vsel %vm849_vm6, %v820_v40, %v2751_v49  ;;  %v2850_v52 = vld [vmem:[%s3939_s28] ss:$0 sm:$0xff]  ;;  %s3943_s28 = sld [smem:[#allocation18_spill]] }
 0x14a   : > { %v2754_v51 = vpop.permute.xlu0 %2753 }
 0x14b   : > { %v2756_v53 = vunpack.i.h.bf16 %v2754_v51  ;;  %v2755_v54 = vunpack.i.l.bf16 %v2754_v51 }
 0x14d   : > { %v853_v57 = vsel %vm852_vm7, %v850_v55, %v2755_v54  ;;  %v854_v58 = vsel %vm852_vm7, %v851_v56, %v2756_v53 }
 0x14e   : > { %v855_v59 = vpack.c.bf16 %v854_v58, %v853_v57 }
 0x150   : > { %2503 = vmatmul.msk.bf16.vlgmr.msra.gmra.mxu1 %vm908_vm8, %v855_v59 }
 0x1cd   : > { %v921_v61 = vpop.f32.mrf.mxu1 }
 0x1ce   : > { %v922_v62 = vadd.f32 %v2849_v60, %v921_v61 }
 0x1d0   : > { %v928_v63 = vmul.f32 %v922_v62, %v922_v62  ;;  %v926_v20 = vmul.f32 0.5, %v922_v62 }
 0x1d2   : > { %v930_v0 = vmul.f32 %v928_v63, %v922_v62  ;;  %v2677_v63 = vld [vmem:[%s3940_s5 + $0x28] sm:$0xff] }
 0x1d3   : > { %1162 = vmatpush.bf16.msra.mxu3 %v2677_v63 }
 0x1d4   : > { %v932_v1 = vmul.f32 0.044715, %v930_v0 }
 0x1d5   : > { %v923_v2 = vpop.f32.mrf.mxu1 }
 0x1d6   : > { %v934_v3 = vadd.f32 %v932_v1, %v922_v62  ;;  %v924_v4 = vadd.f32 %v2849_v60, %v923_v2  ;;  %v2676_v1 = vld [vmem:[%s3940_s5 + $0x20] sm:$0xff] }
 0x1d7   : > { %1163 = vmatpush.bf16.msra.mxu3 %v2676_v1 }
 0x1d8   : > { %v936_v6 = vmul.f32 0.7978846, %v934_v3  ;;  %v929_v8 = vmul.f32 %v924_v4, %v924_v4  ;;  %v927_v23 = vmul.f32 0.5, %v924_v4  ;;  %v2675_v3 = vld [vmem:[%s3940_s5 + $0x18] sm:$0xff] }
 0x1da   : > { %v931_v12 = vmul.f32 %v929_v8, %v924_v4  ;;  %2861 = vtanh.f32 %v936_v6 }
 0x1db   : > { %1164 = vmatpush.bf16.msra.mxu3 %v2675_v3 }
 0x1dc   : > { %v933_v13 = vmul.f32 0.044715, %v931_v12 }
 0x1de   : > { %v935_v16 = vadd.f32 %v933_v13, %v924_v4 }
 0x1e0   : > { %v937_v17 = vmul.f32 0.7978846, %v935_v16  ;;  %v2862_v18 = vpop.eup %2861 }
 0x1e1   : > { %v940_v19 = vadd.f32 1.0, %v2862_v18 }
 0x1e2   : > { %2863 = vtanh.f32 %v937_v17 }
 0x1e3   : > { %v942_v22 = vmul.f32 %v940_v19, %v926_v20 }
 0x1e5   : > { %v944_v26 = vrot.slane %v942_v22, 7  ;;  %v950_v29 = vrot.slane %v942_v22, 1 }
 0x1e8   : > { %v2864_v21 = vpop.eup %2863 }
 0x1e9   : > { %v941_v24 = vadd.f32 1.0, %v2864_v21 }
 0x1eb   : > { %v943_v25 = vmul.f32 %v941_v24, %v927_v23 }
 0x1ed   : > { %v945_v27 = vrot.slane %v943_v25, 7  ;;  %v2757_v28 = vpack.i.bf16 %v943_v25, %v942_v22  ;;  %v951_v30 = vrot.slane %v943_v25, 1 }
 0x1ef   : > { %2758 = vrot.lane.b32.xlu1 %v2757_v28, %s3907_s8  ;;  %v953_v31 = vsel %vm828_vm2, %v951_v30, %v950_v29  ;;  %v946_v32 = vsel %vm819_vm3, %v944_v26, %v945_v27  ;;  %v947_v33 = vsel %vm819_vm3, %v945_v27, %v944_v26  ;;  %v952_v34 = vsel %vm828_vm2, %v950_v29, %v951_v30  ;;  %s3941_s8 = smov 32   ;;  %v2674_v29 = vld [vmem:[%s3940_s5 + $0x10] sm:$0xff]  ;;  %v2673_v30 = vld [vmem:[%s3940_s5 + $0x8] sm:$0xff] }
 0x1f0   : > { %v955_v35 = vsel %vm825_vm4, %v953_v31, 0.0  ;;  %v948_v44 = vsel %vm815_vm5, %v947_v33, 0.0  ;;  %1165 = vmatpush.bf16.msra.mxu3 %v2674_v29  ;;  %v2672_v31 = vld [vmem:[%s3940_s5] sm:$0xff]  ;;  %vm1567_vm2 = vcmp.lt.s32.totalorder %v3140_v7, 3  ;;  %vm2016_vm4 = vcmask 64512   ;;  %s2394_s5 = scalar_lea.sflag [#allocation3], %s755_s27 }
 0x1f1   : > { %v2762_v36 = vpack.i.bf16 %v955_v35, %v952_v34 }
 0x1f4   : > { %1166 = vmatpush.bf16.msra.mxu3 %v2673_v30 }
 0x1f7   : > { %2763 = vrot.lane.b32.xlu1 %v2762_v36, %s3938_s9 }
 0x1f8   : > { %1167 = vmatpush.bf16.msra.mxu3 %v2672_v31 }
 0x261   : > { %v2759_v40 = vpop.permute.xlu1 %2758 }
 0x262   : > { %v2761_v41 = vunpack.i.h.bf16 %v2759_v40  ;;  %v2760_v42 = vunpack.i.l.bf16 %v2759_v40 }
 0x264   : > { %v972_v47 = vsel %vm849_vm6, %v948_v44, %v2760_v42  ;;  %v973_v48 = vsel %vm849_vm6, %v946_v32, %v2761_v41  ;;  %v2851_v44 = vld [vmem:[%s3942_s1] ss:$0 sm:$0xff]  ;;  %s2947_s1 = smov 16  }
 0x269   : > { %v2764_v43 = vpop.permute.xlu1 %2763 }
 0x26a   : > { %v2766_v45 = vunpack.i.h.bf16 %v2764_v43  ;;  %v2765_v46 = vunpack.i.l.bf16 %v2764_v43 }
 0x26c   : > { %v974_v49 = vsel %vm852_vm7, %v972_v47, %v2765_v46  ;;  %v975_v50 = vsel %vm852_vm7, %v973_v48, %v2766_v45 }
 0x26d   : > { %v976_v51 = vpack.c.bf16 %v975_v50, %v974_v49  ;;  %v2683_v49 = vld [vmem:[%s3943_s28 + $0x28] sm:$0xff] }
 0x26e   : > { %1282 = vmatpush.bf16.msra.mxu0 %v2683_v49 }
 0x26f   : > { %2528 = vmatmul.msk.bf16.vlgmr.msrb.gmra.mxu2 %vm908_vm8, %v976_v51 }
 0x2f2   : > { %v1041_v53 = vpop.f32.mrf.mxu2 }
 0x2f3   : > { %v1042_v54 = vadd.f32 %v2850_v52, %v1041_v53 }
 0x2f5   : > { %v3247_v55 = vadd.f32 %v1042_v54, %v3147_v10 }
 0x2f7   : > { %v1050_v56 = vmul.f32 %v3247_v55, %v3247_v55  ;;  %v1048_v11 = vmul.f32 0.5, %v3247_v55 }
 0x2f9   : > { %v1052_v57 = vmul.f32 %v1050_v56, %v3247_v55 }
 0x2fa   : > { %v1043_v58 = vpop.f32.mrf.mxu2 }
 0x2fb   : > { %v1044_v59 = vadd.f32 %v2850_v52, %v1043_v58  ;;  %v1054_v60 = vmul.f32 0.044715, %v1052_v57  ;;  %v2682_v52 = vld [vmem:[%s3943_s28 + $0x20] sm:$0xff]  ;;  %v2681_v58 = vld [vmem:[%s3943_s28 + $0x18] sm:$0xff] }
 0x2fc   : > { %1283 = vmatpush.bf16.msra.mxu0 %v2682_v52 }
 0x2fd   : > { %v3253_v61 = vadd.f32 %v1044_v59, %v3153_v15  ;;  %v1056_v62 = vadd.f32 %v1054_v60, %v3247_v55 }
 0x2ff   : > { %v1051_v10 = vmul.f32 %v3253_v61, %v3253_v61  ;;  %v1058_v0 = vmul.f32 0.7978846, %v1056_v62  ;;  %v1049_v14 = vmul.f32 0.5, %v3253_v61  ;;  %v2680_v62 = vld [vmem:[%s3943_s28 + $0x10] sm:$0xff] }
 0x300   : > { %1284 = vmatpush.bf16.msra.mxu0 %v2681_v58 }
 0x301   : > { %v1053_v2 = vmul.f32 %v1051_v10, %v3253_v61  ;;  %2865 = vtanh.f32 %v1058_v0 }
 0x303   : > { %v1055_v15 = vmul.f32 0.044715, %v1053_v2 }
 0x304   : > { %1285 = vmatpush.bf16.msra.mxu0 %v2680_v62 }
 0x305   : > { %v1057_v4 = vadd.f32 %v1055_v15, %v3253_v61 }
 0x307   : > { %v1059_v5 = vmul.f32 0.7978846, %v1057_v4  ;;  %v2866_v6 = vpop.eup %2865 }
 0x308   : > { %v1062_v8 = vadd.f32 1.0, %v2866_v6 }
 0x309   : > { %2867 = vtanh.f32 %v1059_v5 }
 0x30a   : > { %v1064_v13 = vmul.f32 %v1062_v8, %v1048_v11 }
 0x30c   : > { %v1068_v18 = vrot.slane %v1064_v13, 6  ;;  %v1077_v21 = vrot.slane %v1064_v13, 2 }
 0x30f   : > { %v2868_v12 = vpop.eup %2867 }
 0x310   : > { %v1063_v16 = vadd.f32 1.0, %v2868_v12 }
 0x312   : > { %v1065_v17 = vmul.f32 %v1063_v16, %v1049_v14 }
 0x314   : > { %v1069_v19 = vrot.slane %v1065_v17, 6  ;;  %v2767_v20 = vpack.i.bf16 %v1065_v17, %v1064_v13  ;;  %v1078_v22 = vrot.slane %v1065_v17, 2 }
 0x316   : > { %2768 = vrot.lane.b32.xlu2 %v2767_v20, %s3941_s8  ;;  %v1081_v23 = vsel %vm1079_vm9, %v1078_v22, %v1077_v21  ;;  %v1071_v24 = vsel %vm1070_vm10, %v1068_v18, %v1069_v19  ;;  %v1072_v25 = vsel %vm1070_vm10, %v1069_v19, %v1068_v18  ;;  %v1080_v26 = vsel %vm1079_vm9, %v1077_v21, %v1078_v22  ;;  %v2679_v22 = vld [vmem:[%s3943_s28 + $0x8] sm:$0xff] }
 0x317   : > { %v1083_v27 = vsel %vm1076_vm11, %v1081_v23, 0.0  ;;  %v1073_v36 = vsel %vm1066_vm12, %v1072_v25, 0.0  ;;  %1286 = vmatpush.bf16.msra.mxu0 %v2679_v22  ;;  %v2678_v23 = vld [vmem:[%s3943_s28] sm:$0xff] }
 0x318   : > { %v2772_v28 = vpack.i.bf16 %v1083_v27, %v1080_v26 }
 0x31b   : > { %1287 = vmatpush.bf16.msra.mxu0 %v2678_v23 }
 0x31e   : > { %2773 = vrot.lane.b32.xlu2 %v2772_v28, %s3938_s9 }
 0x370   : > { %v2769_v32 = vpop.permute.xlu2 %2768 }
 0x371   : > { %v2771_v33 = vunpack.i.h.bf16 %v2769_v32  ;;  %v2770_v34 = vunpack.i.l.bf16 %v2769_v32 }
 0x373   : > { %v1100_v39 = vsel %vm849_vm6, %v1073_v36, %v2770_v34  ;;  %v1101_v40 = vsel %vm849_vm6, %v1071_v24, %v2771_v33  ;;  %v2685_v36 = vld [vmem:[%s3944_s15 + $0x8] sm:$0xff] }
 0x374   : > { %1326 = vmatpush.bf16.msrb.mxu0 %v2685_v36 }
 0x378   : > { %v2774_v35 = vpop.permute.xlu2 %2773 }
 0x379   : > { %v2776_v37 = vunpack.i.h.bf16 %v2774_v35  ;;  %v2775_v38 = vunpack.i.l.bf16 %v2774_v35 }
 0x37b   : > { %v1102_v41 = vsel %vm852_vm7, %v1100_v39, %v2775_v38  ;;  %v1103_v42 = vsel %vm852_vm7, %v1101_v40, %v2776_v37  ;;  %v2684_v37 = vld [vmem:[%s3944_s15] sm:$0xff] }
 0x37c   : > { %v1104_v43 = vpack.c.bf16 %v1103_v42, %v1102_v41  ;;  %1327 = vmatpush.bf16.msrb.mxu0 %v2684_v37  ;;  %v2852_v38 = vld [vmem:[%s3945_s10] ss:$0 sm:$0xff] }
 0x37e   : > { %2553 = vmatmul.msk.bf16.vlgmr.msra.gmra.mxu3 %vm908_vm8, %v1104_v43 }
 0x401   : > { %v1169_v45 = vpop.f32.mrf.mxu3 }
 0x402   : > { %v1170_v46 = vadd.f32 %v2851_v44, %v1169_v45 }
 0x404   : > { %v1176_v47 = vmul.f32 %v1170_v46, %v1170_v46  ;;  %v1174_v2 = vmul.f32 0.5, %v1170_v46 }
 0x406   : > { %v1178_v48 = vmul.f32 %v1176_v47, %v1170_v46 }
 0x408   : > { %v1180_v50 = vmul.f32 0.044715, %v1178_v48 }
 0x409   : > { %v1171_v51 = vpop.f32.mrf.mxu3 }
 0x40a   : > { %v1182_v53 = vadd.f32 %v1180_v50, %v1170_v46  ;;  %v1172_v54 = vadd.f32 %v2851_v44, %v1171_v51 }
 0x40c   : > { %v1184_v56 = vmul.f32 0.7978846, %v1182_v53  ;;  %v1177_v57 = vmul.f32 %v1172_v54, %v1172_v54  ;;  %v1175_v4 = vmul.f32 0.5, %v1172_v54 }
 0x40e   : > { %v1179_v59 = vmul.f32 %v1177_v57, %v1172_v54  ;;  %2869 = vtanh.f32 %v1184_v56 }
 0x410   : > { %v1181_v60 = vmul.f32 0.044715, %v1179_v59 }
 0x412   : > { %v1183_v63 = vadd.f32 %v1181_v60, %v1172_v54 }
 0x414   : > { %v1185_v10 = vmul.f32 0.7978846, %v1183_v63  ;;  %v2870_v0 = vpop.eup %2869 }
 0x415   : > { %v1188_v1 = vadd.f32 1.0, %v2870_v0 }
 0x416   : > { %2871 = vtanh.f32 %v1185_v10 }
 0x417   : > { %v1190_v3 = vmul.f32 %v1188_v1, %v1174_v2 }
 0x419   : > { %v1198_v8 = vrot.slane %v1190_v3, 2  ;;  %v1192_v14 = vrot.slane %v1190_v3, 6 }
 0x41c   : > { %v2872_v15 = vpop.eup %2871 }
 0x41d   : > { %v1189_v5 = vadd.f32 1.0, %v2872_v15 }
 0x41f   : > { %v1191_v6 = vmul.f32 %v1189_v5, %v1175_v4  ;;  %v2691_v5 = vld [vmem:[%s3946_s11 + $0x28] sm:$0xff] }
 0x420   : > { %1443 = vmatpush.bf16.msra.mxu2 %v2691_v5 }
 0x421   : > { %v2777_v11 = vpack.i.bf16 %v1191_v6, %v1190_v3  ;;  %v1199_v12 = vrot.slane %v1191_v6, 2  ;;  %v1193_v13 = vrot.slane %v1191_v6, 6  ;;  %v2690_v6 = vld [vmem:[%s3946_s11 + $0x20] sm:$0xff] }
 0x423   : > { %2778 = vrot.lane.b32.xlu0 %v2777_v11, %s3941_s8  ;;  %v1200_v16 = vsel %vm1079_vm9, %v1198_v8, %v1199_v12  ;;  %v1201_v17 = vsel %vm1079_vm9, %v1199_v12, %v1198_v8  ;;  %v1194_v18 = vsel %vm1070_vm10, %v1192_v14, %v1193_v13  ;;  %v1195_v19 = vsel %vm1070_vm10, %v1193_v13, %v1192_v14  ;;  %v2689_v8 = vld [vmem:[%s3946_s11 + $0x18] sm:$0xff]  ;;  %v2688_v11 = vld [vmem:[%s3946_s11 + $0x10] sm:$0xff]  ;;  %v2687_v12 = vld [vmem:[%s3946_s11 + $0x8] sm:$0xff] }
 0x424   : > { %v1203_v20 = vsel %vm1076_vm11, %v1201_v17, 0.0  ;;  %v1196_v28 = vsel %vm1066_vm12, %v1195_v19, 0.0  ;;  %1444 = vmatpush.bf16.msra.mxu2 %v2690_v6  ;;  %v2686_v13 = vld [vmem:[%s3946_s11] sm:$0xff]  ;;  %vm2307_vm9 = vcmask 1043459   ;;  %vm2313_vm11 = vcmask 1045509  }
 0x425   : > { %v2782_v21 = vpack.i.bf16 %v1203_v20, %v1200_v16 }
 0x427   : > { %2783 = vrot.lane.b32.xlu1 %v2782_v21, %s3938_s9 }
 0x428   : > { %1445 = vmatpush.bf16.msra.mxu2 %v2689_v8 }
 0x42c   : > { %1446 = vmatpush.bf16.msra.mxu2 %v2688_v11  ;;  %v2855_v11 = vld [vmem:[%s3885_s14] ss:$0 sm:$0xff] }
 0x430   : > { %1447 = vmatpush.bf16.msra.mxu2 %v2687_v12  ;;  %v2853_v12 = vld [vmem:[%s3887_s16] ss:$0 sm:$0xff] }
 0x434   : > { %1448 = vmatpush.bf16.msra.mxu2 %v2686_v13 }
 0x495   : > { %v2779_v24 = vpop.permute.xlu0 %2778 }
 0x496   : > { %v2781_v25 = vunpack.i.h.bf16 %v2779_v24  ;;  %v2780_v26 = vunpack.i.l.bf16 %v2779_v24 }
 0x498   : > { %v1220_v31 = vsel %vm849_vm6, %v1196_v28, %v2780_v26  ;;  %v1221_v32 = vsel %vm849_vm6, %v1194_v18, %v2781_v25 }
 0x499   : > { %v2784_v27 = vpop.permute.xlu1 %2783 }
 0x49a   : > { %v2786_v29 = vunpack.i.h.bf16 %v2784_v27  ;;  %v2785_v30 = vunpack.i.l.bf16 %v2784_v27  ;;  %v2854_v27 = vld [vmem:[%s3883_s12] ss:$0 sm:$0xff] }
 0x49c   : > { %v1222_v33 = vsel %vm852_vm7, %v1220_v31, %v2785_v30  ;;  %v1223_v34 = vsel %vm852_vm7, %v1221_v32, %v2786_v29 }
 0x49d   : > { %v1224_v35 = vpack.c.bf16 %v1223_v34, %v1222_v33 }
 0x49f   : > { %2578 = vmatmul.msk.bf16.vlgmr.msra.gmra.mxu0 %vm908_vm8, %v1224_v35 }
 0x51c   : > { %v1289_v39 = vpop.f32.mrf.mxu0 }
 0x51d   : > { %v1290_v40 = vadd.f32 %v2852_v38, %v1289_v39 }
 0x51f   : > { %v1294_v41 = vadd.f32 %v1290_v40, %v3247_v55 }
 0x521   : > { %v1336_v42 = vmul.f32 %v1294_v41, %v1294_v41  ;;  %v1334_v58 = vmul.f32 0.5, %v1294_v41 }
 0x523   : > { %v1338_v43 = vmul.f32 %v1336_v42, %v1294_v41 }
 0x524   : > { %v1291_v44 = vpop.f32.mrf.mxu0 }
 0x525   : > { %v1292_v45 = vadd.f32 %v2852_v38, %v1291_v44  ;;  %v1340_v46 = vmul.f32 0.044715, %v1338_v43 }
 0x527   : > { %v1295_v47 = vadd.f32 %v1292_v45, %v3253_v61  ;;  %v1342_v48 = vadd.f32 %v1340_v46, %v1294_v41 }
 0x529   : > { %v1337_v49 = vmul.f32 %v1295_v47, %v1295_v47  ;;  %v1296_v50 = vpack.c.bf16 %v1295_v47, %v1294_v41  ;;  %v1344_v51 = vmul.f32 0.7978846, %v1342_v48  ;;  %v1335_v60 = vmul.f32 0.5, %v1295_v47 }
 0x52b   : > { %2587 = vmatmul.msk.bf16.vlgmr.msrb.gmra.mxu0 %vm849_vm6, %v1296_v50  ;;  %v1339_v52 = vmul.f32 %v1337_v49, %v1295_v47  ;;  %2873 = vtanh.f32 %v1344_v51 }
 0x52d   : > { %v1341_v53 = vmul.f32 0.044715, %v1339_v52 }
 0x52f   : > { %v1343_v54 = vadd.f32 %v1341_v53, %v1295_v47 }
 0x531   : > { %v1345_v56 = vmul.f32 0.7978846, %v1343_v54  ;;  %v2874_v57 = vpop.eup %2873 }
 0x532   : > { %v1348_v55 = vadd.f32 1.0, %v2874_v57 }
 0x533   : > { %2875 = vtanh.f32 %v1345_v56 }
 0x534   : > { %v1350_v63 = vmul.f32 %v1348_v55, %v1334_v58  ;;  %v2694_v55 = vld [vmem:[%s3884_s13 + $0x10] sm:$0xff]  ;;  %v2693_v58 = vld [vmem:[%s3884_s13 + $0x8] sm:$0xff] }
 0x535   : > { %1540 = vmatpush.bf16.msrb.mxu3 %v2694_v55 }
 0x536   : > { %v1354_v1 = vrot.slane %v1350_v63, 4 }
 0x539   : > { %v2876_v59 = vpop.eup %2875  ;;  %1541 = vmatpush.bf16.msrb.mxu3 %v2693_v58 }
 0x53a   : > { %v1349_v62 = vadd.f32 1.0, %v2876_v59  ;;  %v2692_v59 = vld [vmem:[%s3884_s13] sm:$0xff] }
 0x53c   : > { %v1351_v61 = vmul.f32 %v1349_v62, %v1335_v60 }
 0x53d   : > { %1542 = vmatpush.bf16.msrb.mxu3 %v2692_v59 }
 0x53e   : > { %v1355_v10 = vrot.slane %v1351_v61, 4  ;;  %v2787_v0 = vpack.i.bf16 %v1351_v61, %v1350_v63 }
 0x540   : > { %2788 = vrot.lane.b32.xlu2 %v2787_v0, %s3941_s8  ;;  %v1357_v2 = vsel %vm1356_vm13, %v1354_v1, %v1355_v10  ;;  %v1358_v15 = vsel %vm1356_vm13, %v1355_v10, %v1354_v1 }
 0x541   : > { %v1364_v3 = vsel %vm1362_vm14, %v1358_v15, 0.0  ;;  %v1359_v19 = vsel %vm1352_vm15, %v1358_v15, 0.0 }
 0x542   : > { %v2792_v4 = vpack.i.bf16 %v1364_v3, %v1357_v2 }
 0x544   : > { %2793 = vrot.lane.b32.xlu0 %v2792_v4, %s3938_s9  ;;  %s2701_s9 = sshll.u32 %s3102_s7, 4 }
 0x545   : > { %s2405_s10 = scalar_lea.hbm %s3896_s25, %s2701_s9 }
 0x59a   : > { %v2789_v14 = vpop.permute.xlu2 %2788 }
 0x59b   : > { %v2791_v16 = vunpack.i.h.bf16 %v2789_v14  ;;  %v2790_v17 = vunpack.i.l.bf16 %v2789_v14 }
 0x59d   : > { %v1381_v22 = vsel %vm849_vm6, %v1359_v19, %v2790_v17  ;;  %v1382_v23 = vsel %vm849_vm6, %v1357_v2, %v2791_v16 }
 0x5a8   : > { %v1329_v6 = vpop.f32.mrf.mxu0 }
 0x5a9   : > { %v1330_v17 = vadd.f32 %v2853_v12, %v1329_v6  ;;  %v1927_v6 = vld [vmem:[%s3891_s20 + $0x8] sm:$0xff] }
 0x5b0   : > { %v1331_v13 = vpop.f32.mrf.mxu0 }
 0x5b6   : > { %v2794_v18 = vpop.permute.xlu0 %2793 }
 0x5b7   : > { %v2796_v20 = vunpack.i.h.bf16 %v2794_v18  ;;  %v2795_v21 = vunpack.i.l.bf16 %v2794_v18  ;;  %v1332_v18 = vadd.f32 %v2853_v12, %v1331_v13 }
 0x5b9   : > { %v1383_v24 = vsel %vm852_vm7, %v1381_v22, %v2795_v21  ;;  %v1384_v25 = vsel %vm852_vm7, %v1382_v23, %v2796_v20  ;;  %v2699_v23 = vld [vmem:[%s3890_s19] sm:$0xff] }
 0x5ba   : > { %v1385_v26 = vpack.c.bf16 %v1384_v25, %v1383_v24  ;;  %v1659_v24 = vld [vmem:[%s3890_s19 + $0x8] sm:$0x1] }
 0x5bb   : > { %v1665_v25 = vunpack.c.l.b16 %v1659_v24 }
 0x5bc   : > { %2612 = vmatmul.msk.bf16.vlgmr.msra.gmra.mxu2 %vm908_vm8, %v1385_v26  ;;  %vm2304_vm8 = vcmask 1042434  }
 0x5bd   : > { %v1667_v26 = vpack.c.b16 %v1665_v25, %v1665_v25 }
 0x63f   : > { %v1450_v28 = vpop.f32.mrf.mxu2 }
 0x640   : > { %v1451_v29 = vadd.f32 %v2854_v27, %v1450_v28 }
 0x642   : > { %v1457_v30 = vmul.f32 %v1451_v29, %v1451_v29  ;;  %v1455_v44 = vmul.f32 0.5, %v1451_v29 }
 0x644   : > { %v1459_v31 = vmul.f32 %v1457_v30, %v1451_v29 }
 0x646   : > { %v1461_v32 = vmul.f32 0.044715, %v1459_v31 }
 0x647   : > { %v1452_v33 = vpop.f32.mrf.mxu2 }
 0x648   : > { %v1463_v34 = vadd.f32 %v1461_v32, %v1451_v29  ;;  %v1453_v35 = vadd.f32 %v2854_v27, %v1452_v33 }
 0x64a   : > { %v1465_v36 = vmul.f32 0.7978846, %v1463_v34  ;;  %v1458_v37 = vmul.f32 %v1453_v35, %v1453_v35  ;;  %v1456_v46 = vmul.f32 0.5, %v1453_v35 }
 0x64c   : > { %v1460_v38 = vmul.f32 %v1458_v37, %v1453_v35  ;;  %2877 = vtanh.f32 %v1465_v36 }
 0x64e   : > { %v1462_v39 = vmul.f32 0.044715, %v1460_v38 }
 0x650   : > { %v1464_v40 = vadd.f32 %v1462_v39, %v1453_v35 }
 0x652   : > { %v1466_v41 = vmul.f32 0.7978846, %v1464_v40  ;;  %v2878_v42 = vpop.eup %2877 }
 0x653   : > { %v1469_v43 = vadd.f32 1.0, %v2878_v42 }
 0x654   : > { %2879 = vtanh.f32 %v1466_v41 }
 0x655   : > { %v1471_v48 = vmul.f32 %v1469_v43, %v1455_v44 }
 0x657   : > { %v1473_v52 = vrot.slane %v1471_v48, 4 }
 0x65a   : > { %v2880_v45 = vpop.eup %2879 }
 0x65b   : > { %v1470_v47 = vadd.f32 1.0, %v2880_v45 }
 0x65d   : > { %v1472_v49 = vmul.f32 %v1470_v47, %v1456_v46 }
 0x65f   : > { %v1474_v50 = vrot.slane %v1472_v49, 4  ;;  %v2797_v51 = vpack.i.bf16 %v1472_v49, %v1471_v48 }
 0x661   : > { %2798 = vrot.lane.b32.xlu1 %v2797_v51, %s2947_s1  ;;  %v1475_v53 = vsel %vm1356_vm13, %v1473_v52, %v1474_v50  ;;  %v1476_v54 = vsel %vm1356_vm13, %v1474_v50, %v1473_v52  ;;  %vm2349_vm13 = vcmask 1040384  }
 0x662   : > { %v1480_v56 = vsel %vm1362_vm14, %v1476_v54, 0.0  ;;  %v1477_v10 = vsel %vm1352_vm15, %v1476_v54, 0.0  ;;  %vm2319_vm14 = vcmask 1047559  }
 0x663   : > { %v2802_v57 = vpack.i.bf16 %v1480_v56, %v1475_v53 }
 0x665   : > { %2803 = vrot.lane.b32.xlu2 %v2802_v57, %s3941_s8 }
 0x6bf   : > { %v2804_v60 = vpop.permute.xlu2 %2803 }
 0x6c0   : > { %v2806_v0 = vunpack.i.h.bf16 %v2804_v60  ;;  %v2805_v1 = vunpack.i.l.bf16 %v2804_v60 }
 0x6d3   : > { %v2799_v62 = vpop.permute.xlu1 %2798 }
 0x6d4   : > { %v2801_v63 = vunpack.i.h.bf16 %v2799_v62  ;;  %v2800_v61 = vunpack.i.l.bf16 %v2799_v62 }
 0x6d6   : > { %v1498_v2 = vsel %vm1497_vm0, %v1477_v10, %v2800_v61  ;;  %v1499_v15 = vsel %vm1497_vm0, %v1475_v53, %v2801_v63 }
 0x6d7   : > { %v1500_v3 = vsel %vm849_vm6, %v1498_v2, %v2805_v1  ;;  %v1501_v4 = vsel %vm849_vm6, %v1499_v15, %v2806_v0  ;;  %v1926_v2 = vld [vmem:[%s3891_s20] sm:$0xff] }
 0x6d8   : > { %v1502_v5 = vpack.c.bf16 %v1501_v4, %v1500_v3  ;;  %v1944_v15 = vld [vmem:[%s3892_s21] sm:$0xff] }
 0x6da   : > { %2625 = vmatmul.msk.bf16.vlgmr.msrb.gmra.mxu3 %vm1531_vm1, %v1502_v5 }
 0x75d   : > { %v1544_v8 = vpop.f32.mrf.mxu3 }
 0x75e   : > { %v1545_v14 = vadd.f32 %v2855_v11, %v1544_v8  ;;  %v1945_v8 = vld [vmem:[%s3892_s21 + $0x8] sm:$0xff] }
 0x760   : > { %v3424_v20 = vadd.f32 %v1545_v14, %v1330_v17 }
 0x762   : > { %v1551_v63 = vrot.slane %v3424_v20, 7  ;;  %v1565_v12 = vrot.slane %v3424_v20, 5 }
 0x765   : > { %v1546_v16 = vpop.f32.mrf.mxu3 }
 0x766   : > { %v1547_v19 = vadd.f32 %v2855_v11, %v1546_v16 }
 0x768   : > { %v3426_v21 = vadd.f32 %v1547_v19, %v1332_v18 }
 0x76a   : > { %v1656_v22 = vpack.c.bf16 %v3426_v21, %v3424_v20  ;;  %v1552_v62 = vrot.slane %v3426_v21, 7  ;;  %v1566_v4 = vrot.slane %v3426_v21, 5 }
 0x76c   : > { %1681 = vmatpush.bf16.msrb.mxu1 %v1656_v22  ;;  %v1554_v10 = vsel %vm819_vm3, %v1552_v62, %v1551_v63  ;;  %v1553_v1 = vsel %vm819_vm3, %v1551_v63, %v1552_v62  ;;  %vm1563_vm3 = vcmp.ge.s32.totalorder %v3140_v7, 3  ;;  %v1569_v16 = vsel %vm1567_vm2, %v1566_v4, %v1565_v12 }
 0x76f   : > { %2647 = vmatmul.msk.bf16.vlgmr.msrb.gmra.mxu1 %vm1497_vm0, %v2699_v23  ;;  %v1568_v23 = vsel %vm1567_vm2, %v1565_v12, %v1566_v4 }
 0x77f   : > { %2648 = vmatmul.msk.bf16.gmra.mxu1 %vm1497_vm0, %v1667_v26 }
 0x7ec   : > { %v3438_v27 = vpop.f32.mrf.mxu1 }
 0x7ed   : > { %v1705_v28 = vperm.slane %v3438_v27, 1  ;;  %v1692_v29 = vperm.slane %v3438_v27, 0  ;;  %v1744_v30 = vperm.slane %v3438_v27, 4  ;;  %v1718_v31 = vperm.slane %v3438_v27, 2 }
 0x7ee   : > { %v1731_v33 = vperm.slane %v3438_v27, 3  ;;  %v1783_v35 = vperm.slane %v3438_v27, 7  ;;  %v1757_v38 = vperm.slane %v3438_v27, 5  ;;  %v1770_v41 = vperm.slane %v3438_v27, 6 }
 0x7ef   : > { %1710 = vperm.xlu2 %2809, %v1705_v28   ;;  %1703 = vperm.xlu1 %2808, %v1692_v29   ;;  %v1570_v27 = vsel %vm1563_vm3, %v1569_v16, 0.0 }
 0x7f0   : > { %1697 = vperm.xlu0 %2807, %v1692_v29  }
 0x7f4   : > { %v3447_v32 = vpop.f32.mrf.mxu1 }
 0x7f5   : > { %v1809_v34 = vperm.slane %v3447_v32, 1  ;;  %v1796_v36 = vperm.slane %v3447_v32, 0  ;;  %v1861_v39 = vperm.slane %v3447_v32, 5  ;;  %v1874_v42 = vperm.slane %v3447_v32, 6 }
 0x7f6   : > { %v1822_v43 = vperm.slane %v3447_v32, 2  ;;  %v1887_v45 = vperm.slane %v3447_v32, 7  ;;  %v1835_v46 = vperm.slane %v3447_v32, 3  ;;  %v1848_v47 = vperm.slane %v3447_v32, 4 }
 0x7f7   : > { %2811 = vset.pattern.permute.xlu2 %v3143_v9  ;;  %1716 = vperm.xlu1 %2808, %v1705_v28   ;;  %v1558_v28 = vrot.slane %v3426_v21, 6 }
 0x7f8   : > { %1749 = vperm.xlu0 %2807, %v1744_v30  }
 0x7fc   : > { %v1688_v37 = vpop.f32.mrf.mxu1 }
 0x7fd   : > { %v1913_v44 = vperm.slane %v1688_v37, 1  ;;  %v1900_v54 = vperm.slane %v1688_v37, 0 }
 0x7ff   : > { %1729 = vperm.xlu2 %2811, %v1718_v31   ;;  %2810 = vset.pattern.permute.xlu1 %v3140_v7 }
 0x800   : > { %2817 = vset.pattern.permute.xlu0 %v3143_v9 }
 0x804   : > { %v1690_v40 = vpop.f32.mrf.mxu1 }
 0x807   : > { %1742 = vperm.xlu2 %2811, %v1731_v33   ;;  %1723 = vperm.xlu1 %2810, %v1718_v31  }
 0x808   : > { %1820 = vperm.xlu0 %2817, %v1809_v34  }
 0x80f   : > { %2813 = vset.pattern.permute.xlu2 %v3140_v7  ;;  %1736 = vperm.xlu1 %2810, %v1731_v33   ;;  %v2843_v33 = vpack.i.bf16 %v1568_v23, %v1570_v27 }
 0x810   : > { %2819 = vset.pattern.permute.xlu0 %v3140_v7 }
 0x817   : > { %1788 = vperm.xlu2 %2813, %v1783_v35   ;;  %2812 = vset.pattern.permute.xlu1 %v3143_v9 }
 0x818   : > { %1801 = vperm.xlu0 %2819, %v1796_v36  }
 0x81f   : > { %2815 = vset.pattern.permute.xlu2 %v3143_v9  ;;  %1755 = vperm.xlu1 %2812, %v1744_v30  }
 0x820   : > { %2825 = vset.pattern.permute.xlu0 %v3143_v9 }
 0x827   : > { %1768 = vperm.xlu2 %2815, %v1757_v38   ;;  %1794 = vperm.xlu1 %2812, %v1783_v35  }
 0x828   : > { %1872 = vperm.xlu0 %2825, %v1861_v39  }
 0x82f   : > { %2816 = vset.pattern.permute.xlu2 %v3140_v7  ;;  %2814 = vset.pattern.permute.xlu1 %v3140_v7 }
 0x830   : > { %2826 = vset.pattern.permute.xlu0 %v3140_v7 }
 0x837   : > { %1775 = vperm.xlu2 %2816, %v1770_v41   ;;  %1762 = vperm.xlu1 %2814, %v1757_v38  }
 0x838   : > { %1879 = vperm.xlu0 %2826, %v1874_v42  }
 0x83f   : > { %1827 = vperm.xlu1 %2814, %v1822_v43   ;;  %1814 = vperm.xlu2 %2816, %v1809_v34   ;;  %v1557_v34 = vrot.slane %v3424_v20, 6 }
 0x840   : > { %2828 = vset.pattern.permute.xlu0 %v3143_v9 }
 0x841   : > { %v1560_v38 = vsel %vm1070_vm10, %v1558_v28, %v1557_v34 }
 0x847   : > { %2820 = vset.pattern.permute.xlu1 %v3143_v9  ;;  %2818 = vset.pattern.permute.xlu2 %v3143_v9 }
 0x848   : > { %1924 = vperm.xlu0 %2828, %v1913_v44  }
 0x849   : > { %v3476_v48 = vpop.permute.xlu2 %1710 }
 0x84f   : > { %1833 = vperm.xlu2 %2818, %v1822_v43   ;;  %1807 = vperm.xlu1 %2820, %v1796_v36   ;;  %v1561_v43 = vsel %vm1066_vm12, %v1560_v38, 0.0  ;;  %v3577_v38 = vld [vmem:[%s3893_s22] sm:$0xff]  ;;  %vm2316_vm12 = vcmask 1046534  }
 0x850   : > { %1898 = vperm.xlu0 %2828, %v1887_v45  }
 0x857   : > { %2821 = vset.pattern.permute.xlu2 %v3140_v7  ;;  %1846 = vperm.xlu1 %2820, %v1835_v46  }
 0x859   : > { %v3479_v49 = vpop.permute.xlu2 %1729 }
 0x85f   : > { %1840 = vperm.xlu2 %2821, %v1835_v46   ;;  %2822 = vset.pattern.permute.xlu1 %v3140_v7  ;;  %v1929_v46 = vld [vmem:[%s3891_s20 + $0x18] sm:$0xff] }
 0x861   : > { %v1704_v50 = vpop.permute.xlu1 %1703  ;;  %v3483_v51 = vpop.permute.xlu2 %1742 }
 0x862   : > { %v1698_v57 = vpop.permute.xlu0 %1697  ;;  %v2128_v17 = vmul.f32 %v1945_v8, %v1704_v50  ;;  %v1963_v29 = vmul.f32 %v1927_v6, %v1704_v50 }
 0x863   : > { %v2127_v13 = vmul.f32 %v1944_v15, %v1698_v57  ;;  %v1962_v24 = vmul.f32 %v1926_v2, %v1698_v57 }
 0x867   : > { %2823 = vset.pattern.permute.xlu2 %v3143_v9  ;;  %1853 = vperm.xlu1 %2822, %v1848_v47  }
 0x869   : > { %v3485_v52 = vpop.permute.xlu1 %1716 }
 0x86a   : > { %v3500_v60 = vpop.permute.xlu0 %1749 }
 0x86f   : > { %1859 = vperm.xlu2 %2823, %v1848_v47   ;;  %2827 = vset.pattern.permute.xlu1 %v3143_v9  ;;  %v1947_v47 = vld [vmem:[%s3892_s21 + $0x18] sm:$0xff] }
 0x871   : > { %v3488_v53 = vpop.permute.xlu2 %1788 }
 0x877   : > { %2824 = vset.pattern.permute.xlu2 %v3140_v7  ;;  %1885 = vperm.xlu1 %2827, %v1874_v42   ;;  %v1559_v42 = vsel %vm1070_vm10, %v1557_v34, %v1558_v28  ;;  %vm2310_vm10 = vcmask 1044484  }
 0x878   : > { %v2838_v50 = vpack.i.bf16 %v1559_v42, %v1561_v43 }
 0x879   : > { %v3490_v56 = vpop.permute.xlu1 %1723 }
 0x87a   : > { %v1821_v3 = vpop.permute.xlu0 %1820 }
 0x87b   : > { %v2146_v14 = vmul.f32 %v1927_v6, %v1821_v3  ;;  %v1981_v25 = vmul.f32 %v1945_v8, %v1821_v3 }
 0x87d   : > { %v2164_v26 = vadd.f32 %v2146_v14, %v2128_v17  ;;  %v1999_v35 = vsub.f32 %v1963_v29, %v1981_v25 }
 0x87f   : > { %1866 = vperm.xlu2 %2824, %v1861_v39   ;;  %2829 = vset.pattern.permute.xlu1 %v3140_v7  ;;  %v2182_v36 = vsel %vm2016_vm4, %v2164_v26, 0.0 }
 0x881   : > { %v3492_v55 = vpop.permute.xlu2 %1768  ;;  %v3494_v58 = vpop.permute.xlu1 %1736 }
 0x887   : > { %1918 = vperm.xlu2 %2824, %v1913_v44   ;;  %1905 = vperm.xlu1 %2829, %v1900_v54  }
 0x88f   : > { %2831 = vset.pattern.permute.xlu2 %v3143_v9  ;;  %2830 = vset.pattern.permute.xlu1 %v3143_v9  ;;  %v1555_v9 = vsel %vm815_vm5, %v1554_v10, 0.0  ;;  %vm2301_vm5 = vcmask 1041409  }
 0x890   : > { %v2833_v11 = vpack.i.bf16 %v1553_v1, %v1555_v9  ;;  %v2130_v1 = vmul.f32 %v1947_v47, %v3485_v52 }
 0x891   : > { %v3498_v59 = vpop.permute.xlu2 %1775  ;;  %v3504_v61 = vpop.permute.xlu1 %1755 }
 0x897   : > { %1911 = vperm.xlu2 %2831, %v1900_v54   ;;  %1781 = vperm.xlu1 %2830, %v1770_v41   ;;  %v2018_v41 = vsel %vm2016_vm4, %v1999_v35, 0.0  ;;  %v1928_v54 = vld [vmem:[%s3891_s20 + $0x10] sm:$0xff] }
 0x898   : > { %v1964_v9 = vmul.f32 %v1928_v54, %v3476_v48 }
 0x899   : > { %v1815_v0 = vpop.permute.xlu2 %1814  ;;  %v3530_v22 = vpop.permute.xlu1 %1794 }
 0x89a   : > { %v2145_v5 = vmul.f32 %v1926_v2, %v1815_v0  ;;  %v1980_v18 = vmul.f32 %v1944_v15, %v1815_v0  ;;  %v1965_v0 = vmul.f32 %v1929_v46, %v3485_v52 }
 0x89c   : > { %v2163_v19 = vadd.f32 %v2145_v5, %v2127_v13  ;;  %v1998_v30 = vsub.f32 %v1962_v24, %v1980_v18 }
 0x89e   : > { %v2181_v31 = vsel %vm2016_vm4, %v2163_v19, 0.0  ;;  %v2017_v39 = vsel %vm2016_vm4, %v1998_v30, 0.0 }
 0x89f   : > { %2832 = vset.pattern.permute.xlu2 %v3140_v7  ;;  %2834 = vrot.lane.b32.xlu1 %v2833_v11, %s2947_s1  ;;  %v2183_v37 = vadd.f32 %v2182_v36, %v2181_v31  ;;  %s2948_s1 = smov 48   ;;  %v2019_v44 = vadd.f32 %v2018_v41, %v2017_v39  ;;  %v1946_v7 = vld [vmem:[%s3892_s21 + $0x10] sm:$0xff]  ;;  %v2102_v39 = vrot.slane %v3577_v38, 1 }
 0x8a0   : > { %v2129_v2 = vmul.f32 %v1946_v7, %v3476_v48 }
 0x8a1   : > { %v2184_v32 = vrot.slane %v2183_v37, 4  ;;  %v2020_v63 = vrot.slane %v2019_v44, 4 }
 0x8a3   : > { %v2185_v10 = vadd.f32 %v2184_v32, %v2183_v37  ;;  %v2021_v8 = vadd.f32 %v2020_v63, %v2019_v44  ;;  %v3572_v37 = vld [vmem:[%s3894_s23] sm:$0xff] }
 0x8a4   : > { %v2266_v41 = vrot.slane %v3572_v37, 1 }
 0x8a5   : > { %v2186_v11 = vrot.slane %v2185_v10, 2  ;;  %v2022_v18 = vrot.slane %v2021_v8, 2 }
 0x8a7   : > { %1892 = vperm.xlu2 %2832, %v1887_v45   ;;  %2844 = vrot.lane.b32.xlu1 %v2843_v33, %s2948_s1  ;;  %v2187_v19 = vadd.f32 %v2186_v11, %v2185_v10  ;;  %v2023_v26 = vadd.f32 %v2022_v18, %v2021_v8  ;;  %v1931_v10 = vld [vmem:[%s3891_s20 + $0x28] sm:$0xff]  ;;  %s757_s1 = scalar_lea.vmem [#allocation2], %s2475_s26 }
 0x8a8   : > { %v1967_v8 = vmul.f32 %v1931_v10, %v3479_v49  ;;  %s2406_s15 = sshll.u32 %s757_s1, 4  ;;  %s2407_s15 = int_to_ptr.vmem [resolvable:$true] %s2406_s15 }
 0x8a9   : > { %v3541_v40 = vpop.permute.xlu1 %1762  ;;  %v1834_v45 = vpop.permute.xlu2 %1833  ;;  %v2188_v27 = vrot.slane %v2187_v19, 1  ;;  %v2024_v33 = vrot.slane %v2023_v26, 1 }
 0x8aa   : > { %v1983_v57 = vmul.f32 %v1947_v47, %v1834_v45  ;;  %v2148_v62 = vmul.f32 %v1929_v46, %v1834_v45 }
 0x8ab   : > { %v2189_v34 = vadd.f32 %v2188_v27, %v2187_v19  ;;  %v2025_v32 = vadd.f32 %v2024_v33, %v2023_v26  ;;  %v1935_v26 = vld [vmem:[%s3891_s20 + $0x48] sm:$0xff]  ;;  %v1933_v33 = vld [vmem:[%s3891_s20 + $0x38] sm:$0xff] }
 0x8ac   : > { %v2001_v3 = vsub.f32 %v1965_v0, %v1983_v57  ;;  %v2166_v4 = vadd.f32 %v2148_v62, %v2130_v1  ;;  %v3590_v57 = vpop.permute.xlu0 %1801  ;;  %v1949_v0 = vld [vmem:[%s3892_s21 + $0x28] sm:$0xff] }
 0x8ad   : > { %v2282_v45 = vadd.f32 %v3572_v37, %v2189_v34  ;;  %v2132_v11 = vmul.f32 %v1949_v0, %v3479_v49  ;;  %v1953_v27 = vld [vmem:[%s3892_s21 + $0x48] sm:$0xff] }
 0x8ae   : > { %v2027_v14 = vsel %vm2016_vm4, %v2001_v3, 0.0  ;;  %v2191_v16 = vsel %vm2016_vm4, %v2166_v4, 0.0  ;;  %v2118_v3 = vadd.f32 %v3577_v38, %v2025_v32  ;;  %v1952_v32 = vld [vmem:[%s3892_s21 + $0x40] sm:$0xff] }
 0x8af   : > { %2839 = vrot.lane.b32.xlu2 %v2838_v50, %s3941_s8 }
 0x8b1   : > { %v1828_v15 = vpop.permute.xlu1 %1827 }
 0x8b2   : > { %v1982_v5 = vmul.f32 %v1946_v7, %v1828_v15  ;;  %v2147_v6 = vmul.f32 %v1928_v54, %v1828_v15  ;;  %v1930_v54 = vld [vmem:[%s3891_s20 + $0x20] sm:$0xff] }
 0x8b3   : > { %v1948_v7 = vld [vmem:[%s3892_s21 + $0x20] sm:$0xff] }
 0x8b4   : > { %v2000_v12 = vsub.f32 %v1964_v9, %v1982_v5  ;;  %v2165_v13 = vadd.f32 %v2147_v6, %v2129_v2  ;;  %v2332_v2 = vrot.slane %v2282_v45, 7  ;;  %v1966_v5 = vmul.f32 %v1930_v54, %v3490_v56  ;;  %v1932_v45 = vld [vmem:[%s3891_s20 + $0x30] sm:$0xff] }
 0x8b5   : > { %v2131_v6 = vmul.f32 %v1948_v7, %v3490_v56 }
 0x8b6   : > { %v2026_v17 = vsel %vm2016_vm4, %v2000_v12, 0.0  ;;  %v2190_v52 = vsel %vm2016_vm4, %v2165_v13, 0.0 }
 0x8b7   : > { %v2028_v48 = vadd.f32 %v2027_v14, %v2026_v17  ;;  %v2192_v23 = vadd.f32 %v2191_v16, %v2190_v52 }
 0x8b9   : > { %v2029_v24 = vrot.slane %v2028_v48, 4  ;;  %v2193_v25 = vrot.slane %v2192_v23, 4  ;;  %v1841_v50 = vpop.permute.xlu2 %1840 }
 0x8ba   : > { %v1984_v1 = vmul.f32 %v1948_v7, %v1841_v50  ;;  %v2149_v9 = vmul.f32 %v1930_v54, %v1841_v50  ;;  %v1969_v50 = vmul.f32 %v1933_v33, %v3483_v51  ;;  %v3643_v54 = vld [vmem:[%s3892_s21 + $0x80] sm:$0xff] }
 0x8bb   : > { %v2030_v28 = vadd.f32 %v2029_v24, %v2028_v48  ;;  %v2194_v29 = vadd.f32 %v2193_v25, %v2192_v23  ;;  %v1873_v23 = vpop.permute.xlu0 %1872 }
 0x8bc   : > { %v2002_v16 = vsub.f32 %v1966_v5, %v1984_v1  ;;  %v2167_v17 = vadd.f32 %v2149_v9, %v2131_v6  ;;  %v3652_v5 = vmul.f32 %v3643_v54, %v3590_v57 }
 0x8bd   : > { %v2031_v30 = vrot.slane %v2030_v28, 2  ;;  %v2195_v31 = vrot.slane %v2194_v29, 2 }
 0x8be   : > { %v2035_v56 = vsel %vm2016_vm4, %v2002_v16, 0.0  ;;  %v2199_v24 = vsel %vm2016_vm4, %v2167_v17, 0.0  ;;  %v2267_v17 = vrot.slane %v3572_v37, 2 }
 0x8bf   : > { %v2032_v35 = vadd.f32 %v2031_v30, %v2030_v28  ;;  %v2196_v36 = vadd.f32 %v2195_v31, %v2194_v29  ;;  %v1989_v30 = vmul.f32 %v1953_v27, %v1873_v23  ;;  %v2154_v31 = vmul.f32 %v1935_v26, %v1873_v23 }
 0x8c1   : > { %v2033_v42 = vrot.slane %v2032_v35, 1  ;;  %v2197_v43 = vrot.slane %v2196_v36, 1  ;;  %v3581_v44 = vpop.permute.xlu1 %1807 }
 0x8c3   : > { %v2034_v46 = vadd.f32 %v2033_v42, %v2032_v35  ;;  %v2198_v47 = vadd.f32 %v2197_v43, %v2196_v36  ;;  %v2136_v42 = vmul.f32 %v1953_v27, %v3504_v61  ;;  %v1934_v43 = vld [vmem:[%s3891_s20 + $0x40] sm:$0xff]  ;;  %v1880_v6 = vpop.permute.xlu0 %1879 }
 0x8c5   : > { %v2119_v62 = vadd.f32 %v2102_v39, %v2034_v46  ;;  %v2283_v63 = vadd.f32 %v2266_v41, %v2198_v47  ;;  %v1951_v39 = vld [vmem:[%s3892_s21 + $0x38] sm:$0xff]  ;;  %v1971_v41 = vmul.f32 %v1935_v26, %v3504_v61  ;;  %v1950_v61 = vld [vmem:[%s3892_s21 + $0x30] sm:$0xff] }
 0x8c6   : > { %v2134_v9 = vmul.f32 %v1951_v39, %v3483_v51  ;;  %v1936_v51 = vld [vmem:[%s3891_s20 + $0x50] sm:$0xff] }
 0x8c7   : > { %v2333_v15 = vrot.slane %v2283_v63, 6  ;;  %v2300_v4 = vrot.slane %v2119_v62, 7  ;;  %v2007_v7 = vsub.f32 %v1971_v41, %v1989_v30  ;;  %v2172_v62 = vadd.f32 %v2154_v31, %v2136_v42 }
 0x8c8   : > { %v3662_v26 = vmul.f32 %v1936_v51, %v3541_v40 }
 0x8c9   : > { %v1847_v12 = vpop.permute.xlu1 %1846  ;;  %v3604_v13 = vsel %vm2301_vm5, %v2300_v4, %v2118_v3  ;;  %v3607_v14 = vsel %vm2304_vm8, %v2333_v15, %v2332_v2  ;;  %v1860_v34 = vpop.permute.xlu2 %1859  ;;  %v1970_v2 = vmul.f32 %v1934_v43, %v3500_v60  ;;  %v2135_v15 = vmul.f32 %v1952_v32, %v3500_v60 }
 0x8ca   : > { %v1985_v52 = vmul.f32 %v1949_v0, %v1847_v12  ;;  %v2150_v18 = vmul.f32 %v1931_v10, %v1847_v12  ;;  %v1987_v63 = vmul.f32 %v1951_v39, %v1860_v34  ;;  %v2152_v10 = vmul.f32 %v1933_v33, %v1860_v34  ;;  %v3667_v34 = vld [vmem:[%s3891_s20 + $0x88] sm:$0xff] }
 0x8cb   : > { %v1968_v3 = vmul.f32 %v1932_v45, %v3494_v58  ;;  %v2133_v4 = vmul.f32 %v1950_v61, %v3494_v58  ;;  %v2054_v12 = vsel %vm2016_vm4, %v2007_v7, 0.0  ;;  %v2218_v16 = vsel %vm2016_vm4, %v2172_v62, 0.0 }
 0x8cc   : > { %v2003_v19 = vsub.f32 %v1967_v8, %v1985_v52  ;;  %v2168_v48 = vadd.f32 %v2150_v18, %v2132_v11  ;;  %v2103_v60 = vrot.slane %v3577_v38, 2  ;;  %v2005_v58 = vsub.f32 %v1969_v50, %v1987_v63  ;;  %v3683_v50 = vpop.permute.xlu0 %1924 }
 0x8cd   : > { %v2170_v52 = vadd.f32 %v2152_v10, %v2134_v9  ;;  %v2162_v10 = vmul.f32 %v3667_v34, %v3683_v50 }
 0x8ce   : > { %v2036_v49 = vsel %vm2016_vm4, %v2003_v19, 0.0  ;;  %v2200_v25 = vsel %vm2016_vm4, %v2168_v48, 0.0 }
 0x8cf   : > { %v2037_v28 = vadd.f32 %v2036_v49, %v2035_v56  ;;  %v2201_v29 = vadd.f32 %v2200_v25, %v2199_v24  ;;  %v2209_v39 = vsel %vm2016_vm4, %v2170_v52, 0.0  ;;  %v1955_v52 = vld [vmem:[%s3892_s21 + $0x58] sm:$0xff] }
 0x8d1   : > { %v2038_v35 = vrot.slane %v2037_v28, 4  ;;  %v2202_v36 = vrot.slane %v2201_v29, 4 }
 0x8d3   : > { %v2039_v46 = vadd.f32 %v2038_v35, %v2037_v28  ;;  %v2203_v47 = vadd.f32 %v2202_v36, %v2201_v29  ;;  %v3672_v35 = vld [vmem:[%s3892_s21 + $0x88] sm:$0xff]  ;;  %v2045_v36 = vsel %vm2016_vm4, %v2005_v58, 0.0 }
 0x8d5   : > { %v2040_v0 = vrot.slane %v2039_v46, 2  ;;  %v2204_v1 = vrot.slane %v2203_v47, 2 }
 0x8d7   : > { %v2041_v8 = vadd.f32 %v2040_v0, %v2039_v46  ;;  %v2205_v11 = vadd.f32 %v2204_v1, %v2203_v47  ;;  %v1954_v47 = vld [vmem:[%s3892_s21 + $0x50] sm:$0xff]  ;;  %v2144_v0 = vmul.f32 %v3672_v35, %v3581_v44 }
 0x8d9   : > { %v2042_v18 = vrot.slane %v2041_v8, 1  ;;  %v2206_v19 = vrot.slane %v2205_v11, 1  ;;  %v1867_v48 = vpop.permute.xlu2 %1866  ;;  %v1854_v23 = vpop.permute.xlu1 %1853 }
 0x8da   : > { %v1988_v56 = vmul.f32 %v1952_v32, %v1867_v48  ;;  %v2153_v24 = vmul.f32 %v1934_v43, %v1867_v48  ;;  %v1986_v49 = vmul.f32 %v1950_v61, %v1854_v23  ;;  %v2151_v25 = vmul.f32 %v1932_v45, %v1854_v23 }
 0x8db   : > { %v2043_v27 = vadd.f32 %v2042_v18, %v2041_v8  ;;  %v2207_v28 = vadd.f32 %v2206_v19, %v2205_v11  ;;  %v2155_v18 = vmul.f32 %v1936_v51, %v1880_v6  ;;  %v2180_v48 = vadd.f32 %v2162_v10, %v2144_v0 }
 0x8dc   : > { %v2006_v29 = vsub.f32 %v1970_v2, %v1988_v56  ;;  %v2171_v30 = vadd.f32 %v2153_v24, %v2135_v15  ;;  %v2004_v31 = vsub.f32 %v1968_v3, %v1986_v49  ;;  %v2169_v33 = vadd.f32 %v2151_v25, %v2133_v4  ;;  %v3692_v2 = vld [vmem:[%s3891_s20 + $0x80] sm:$0xff] }
 0x8dd   : > { %v2120_v41 = vadd.f32 %v2103_v60, %v2043_v27  ;;  %v2284_v42 = vadd.f32 %v2267_v17, %v2207_v28  ;;  %v2138_v28 = vmul.f32 %v1955_v52, %v3492_v55 }
 0x8de   : > { %v2053_v43 = vsel %vm2016_vm4, %v2006_v29, 0.0  ;;  %v2217_v32 = vsel %vm2016_vm4, %v2171_v30, 0.0  ;;  %v2044_v45 = vsel %vm2016_vm4, %v2004_v31, 0.0  ;;  %v2208_v46 = vsel %vm2016_vm4, %v2169_v33, 0.0 }
 0x8df   : > { %v2303_v61 = vrot.slane %v2120_v41, 6  ;;  %v2335_v7 = vrot.slane %v2284_v42, 5  ;;  %v2055_v62 = vadd.f32 %v2054_v12, %v2053_v43  ;;  %v2219_v63 = vadd.f32 %v2218_v16, %v2217_v32  ;;  %v1937_v12 = vld [vmem:[%s3891_s20 + $0x58] sm:$0xff] }
 0x8e0   : > { %v2046_v1 = vadd.f32 %v2045_v36, %v2044_v45  ;;  %v2210_v9 = vadd.f32 %v2209_v39, %v2208_v46  ;;  %v1990_v16 = vmul.f32 %v1954_v47, %v1880_v6  ;;  %v1973_v49 = vmul.f32 %v1937_v12, %v3492_v55 }
 0x8e1   : > { %v2056_v15 = vrot.slane %v2055_v62, 4  ;;  %v2220_v3 = vrot.slane %v2219_v63, 4  ;;  %v3694_v4 = vpop.permute.xlu2 %1918  ;;  %v3698_v8 = vsel %vm2304_vm8, %v2303_v61, %v3604_v13  ;;  %v3702_v11 = vsel %vm2307_vm9, %v2335_v7, %v3607_v14 }
 0x8e2   : > { %v2047_v60 = vrot.slane %v2046_v1, 4  ;;  %v2211_v17 = vrot.slane %v2210_v9, 4  ;;  %v2161_v58 = vmul.f32 %v3692_v2, %v3694_v4  ;;  %v2137_v13 = vmul.f32 %v1954_v47, %v3541_v40 }
 0x8e3   : > { %v2057_v19 = vadd.f32 %v2056_v15, %v2055_v62  ;;  %v2221_v14 = vadd.f32 %v2220_v3, %v2219_v63  ;;  %v2008_v29 = vsub.f32 %v3662_v26, %v1990_v16  ;;  %v2105_v40 = vrot.slane %v3577_v38, 4 }
 0x8e4   : > { %v2048_v23 = vadd.f32 %v2047_v60, %v2046_v1  ;;  %v2212_v56 = vadd.f32 %v2211_v17, %v2210_v9  ;;  %v2179_v24 = vadd.f32 %v2161_v58, %v3652_v5  ;;  %v2173_v33 = vadd.f32 %v2155_v18, %v2137_v13 }
 0x8e5   : > { %v2058_v25 = vrot.slane %v2057_v19, 2  ;;  %v2222_v27 = vrot.slane %v2221_v14, 2  ;;  %v2254_v36 = vsel %vm2016_vm4, %v2180_v48, 0.0  ;;  %v2104_v32 = vrot.slane %v3577_v38, 3 }
 0x8e6   : > { %v2049_v30 = vrot.slane %v2048_v23, 2  ;;  %v2213_v31 = vrot.slane %v2212_v56, 2  ;;  %v2253_v5 = vsel %vm2016_vm4, %v2179_v24, 0.0  ;;  %v2268_v55 = vrot.slane %v3572_v37, 3 }
 0x8e7   : > { %v2059_v6 = vadd.f32 %v2058_v25, %v2057_v19  ;;  %v2223_v51 = vadd.f32 %v2222_v27, %v2221_v14  ;;  %v2269_v7 = vrot.slane %v3572_v37, 4  ;;  %v2255_v10 = vadd.f32 %v2254_v36, %v2253_v5  ;;  %v2698_v19 = vld [vmem:[%s3888_s17 + $0x18] sm:$0xff]  ;;  %v1958_v14 = vld [vmem:[%s3892_s21 + $0x70] sm:$0xff] }
 0x8e8   : > { %v2050_v39 = vadd.f32 %v2049_v30, %v2048_v23  ;;  %v2214_v41 = vadd.f32 %v2213_v31, %v2212_v56  ;;  %v2226_v13 = vsel %vm2016_vm4, %v2173_v33, 0.0  ;;  %1646 = vmatpush.bf16.msra.mxu0 %v2698_v19  ;;  %v2141_v31 = vmul.f32 %v1958_v14, %v3488_v53  ;;  %v1941_v33 = vld [vmem:[%s3891_s20 + $0x78] sm:$0xff] }
 0x8e9   : > { %v2060_v42 = vrot.slane %v2059_v6, 1  ;;  %v2224_v43 = vrot.slane %v2223_v51, 1  ;;  %v1886_v26 = vpop.permute.xlu1 %1885  ;;  %v2256_v23 = vrot.slane %v2255_v10, 4  ;;  %v1959_v36 = vld [vmem:[%s3892_s21 + $0x78] sm:$0xff] }
 0x8ea   : > { %v2051_v45 = vrot.slane %v2050_v39, 1  ;;  %v2215_v46 = vrot.slane %v2214_v41, 1  ;;  %v1991_v47 = vmul.f32 %v1955_v52, %v1886_v26  ;;  %v2156_v61 = vmul.f32 %v1937_v12, %v1886_v26  ;;  %v1940_v12 = vld [vmem:[%s3891_s20 + $0x70] sm:$0xff] }
 0x8eb   : > { %v2061_v62 = vadd.f32 %v2060_v42, %v2059_v6  ;;  %v2225_v63 = vadd.f32 %v2224_v43, %v2223_v51  ;;  %v2062_v52 = vsel %vm2016_vm4, %v2008_v29, 0.0  ;;  %v1976_v27 = vmul.f32 %v1940_v12, %v3488_v53  ;;  %v2697_v6 = vld [vmem:[%s3888_s17 + $0x10] sm:$0xff] }
 0x8ec   : > { %v2052_v0 = vadd.f32 %v2051_v45, %v2050_v39  ;;  %v2216_v1 = vadd.f32 %v2215_v46, %v2214_v41  ;;  %v2009_v9 = vsub.f32 %v1973_v49, %v1991_v47  ;;  %v2174_v15 = vadd.f32 %v2156_v61, %v2138_v28  ;;  %1647 = vmatpush.bf16.msra.mxu0 %v2697_v6  ;;  %v2696_v61 = vld [vmem:[%s3888_s17 + $0x8] sm:$0xff]  ;;  %v1938_v6 = vld [vmem:[%s3891_s20 + $0x60] sm:$0xff] }
 0x8ed   : > { %v2122_v3 = vadd.f32 %v2105_v40, %v2061_v62  ;;  %v2286_v18 = vadd.f32 %v2269_v7, %v2225_v63  ;;  %v1996_v53 = vmul.f32 %v3643_v54, %v3694_v4  ;;  %v2257_v39 = vadd.f32 %v2256_v23, %v2255_v10 }
 0x8ee   : > { %v2121_v16 = vadd.f32 %v2104_v32, %v2052_v0  ;;  %v2285_v60 = vadd.f32 %v2268_v55, %v2216_v1  ;;  %v2063_v17 = vsel %vm2016_vm4, %v2009_v9, 0.0  ;;  %v2227_v58 = vsel %vm2016_vm4, %v2174_v15, 0.0  ;;  %v2695_v15 = vld [vmem:[%s3888_s17] sm:$0xff] }
 0x8ef   : > { %v2064_v56 = vadd.f32 %v2063_v17, %v2062_v52  ;;  %v2228_v24 = vadd.f32 %v2227_v58, %v2226_v13  ;;  %v2309_v49 = vrot.slane %v2122_v3, 4  ;;  %v2339_v40 = vrot.slane %v2286_v18, 3 }
 0x8f0   : > { %v2306_v48 = vrot.slane %v2121_v16, 5  ;;  %v2337_v25 = vrot.slane %v2285_v60, 4  ;;  %v1977_v26 = vmul.f32 %v1941_v33, %v3530_v22  ;;  %v2142_v54 = vmul.f32 %v1959_v36, %v3530_v22  ;;  %1648 = vmatpush.bf16.msra.mxu0 %v2696_v61 }
 0x8f1   : > { %v2065_v28 = vrot.slane %v2064_v56, 4  ;;  %v2229_v29 = vrot.slane %v2228_v24, 4  ;;  %v1912_v30 = vpop.permute.xlu2 %1911  ;;  %v1997_v4 = vmul.f32 %v3672_v35, %v3683_v50  ;;  %v1979_v47 = vmul.f32 %v3667_v34, %v3581_v44 }
 0x8f2   : > { %v2308_v51 = vsel %vm2307_vm9, %v2306_v48, %v3698_v8  ;;  %v1995_v42 = vmul.f32 %v1959_v36, %v1912_v30  ;;  %v2160_v43 = vmul.f32 %v1941_v33, %v1912_v30  ;;  %v2338_v55 = vsel %vm2310_vm10, %v2337_v25, %v3702_v11  ;;  %v1956_v36 = vld [vmem:[%s3892_s21 + $0x60] sm:$0xff] }
 0x8f3   : > { %v2066_v41 = vadd.f32 %v2065_v28, %v2064_v56  ;;  %v2230_v5 = vadd.f32 %v2229_v29, %v2228_v24  ;;  %v2311_v32 = vsel %vm2310_vm10, %v2309_v49, %v2308_v51  ;;  %v1978_v8 = vmul.f32 %v3692_v2, %v3590_v57 }
 0x8f4   : > { %v2340_v11 = vsel %vm2313_vm11, %v2339_v40, %v2338_v55  ;;  %v2106_v2 = vrot.slane %v3577_v38, 5  ;;  %v2270_v62 = vrot.slane %v3572_v37, 5  ;;  %v2258_v22 = vrot.slane %v2257_v39, 2  ;;  %1649 = vmatpush.bf16.msra.mxu0 %v2695_v15 }
 0x8f5   : > { %v2067_v45 = vrot.slane %v2066_v41, 2  ;;  %v2231_v46 = vrot.slane %v2230_v5, 2  ;;  %v2014_v63 = vsub.f32 %v1978_v8, %v1996_v53  ;;  %v2013_v10 = vsub.f32 %v1977_v26, %v1995_v42  ;;  %v1939_v53 = vld [vmem:[%s3891_s20 + $0x68] sm:$0xff] }
 0x8f6   : > { %v2178_v0 = vadd.f32 %v2160_v43, %v2142_v54  ;;  %v2015_v9 = vsub.f32 %v1979_v47, %v1997_v4  ;;  %v2259_v52 = vadd.f32 %v2258_v22, %v2257_v39  ;;  %v1957_v39 = vld [vmem:[%s3892_s21 + $0x68] sm:$0xff]  ;;  %v1974_v26 = vmul.f32 %v1938_v6, %v3498_v59 }
 0x8f7   : > { %v2068_v7 = vadd.f32 %v2067_v45, %v2066_v41  ;;  %v2232_v57 = vadd.f32 %v2231_v46, %v2230_v5  ;;  %v2089_v58 = vsel %vm2016_vm4, %v2014_v63, 0.0  ;;  %v2081_v13 = vsel %vm2016_vm4, %v2013_v10, 0.0  ;;  %v1899_v41 = vpop.permute.xlu0 %1898  ;;  %v2263_v8 = vld [vmem:[%s3894_s23 + $0x8] sm:$0x1] }
 0x8f8   : > { %v2245_v18 = vsel %vm2016_vm4, %v2178_v0, 0.0  ;;  %v2090_v24 = vsel %vm2016_vm4, %v2015_v9, 0.0  ;;  %v2260_v28 = vrot.slane %v2259_v52, 1  ;;  %v2139_v46 = vmul.f32 %v1956_v36, %v3498_v59 }
 0x8f9   : > { %v1906_v35 = vpop.permute.xlu1 %1905  ;;  %v2069_v50 = vrot.slane %v2068_v7, 1  ;;  %v2233_v44 = vrot.slane %v2232_v57, 1  ;;  %v1993_v54 = vmul.f32 %v1957_v39, %v1899_v41  ;;  %v2158_v4 = vmul.f32 %v1939_v53, %v1899_v41 }
 0x8fa   : > { %v1994_v34 = vmul.f32 %v1958_v14, %v1906_v35  ;;  %v2159_v1 = vmul.f32 %v1940_v12, %v1906_v35  ;;  %v2261_v43 = vadd.f32 %v2260_v28, %v2259_v52 }
 0x8fb   : > { %v2070_v3 = vadd.f32 %v2069_v50, %v2068_v7  ;;  %v2234_v16 = vadd.f32 %v2233_v44, %v2232_v57  ;;  %v2272_v57 = vrot.slane %v3572_v37, 7 }
 0x8fc   : > { %v2012_v60 = vsub.f32 %v1976_v27, %v1994_v34  ;;  %v2177_v17 = vadd.f32 %v2159_v1, %v2141_v31  ;;  %v2091_v27 = vadd.f32 %v2090_v24, %v2089_v58 }
 0x8fd   : > { %v2123_v14 = vadd.f32 %v2106_v2, %v2070_v3  ;;  %v2287_v48 = vadd.f32 %v2270_v62, %v2234_v16  ;;  %v2290_v2 = vadd.f32 %v2263_v8, %v2261_v43 }
 0x8fe   : > { %v2080_v19 = vsel %vm2016_vm4, %v2012_v60, 0.0  ;;  %v2244_v12 = vsel %vm2016_vm4, %v2177_v17, 0.0  ;;  %v2092_v5 = vrot.slane %v2091_v27, 4 }
 0x8ff   : > { %v2082_v23 = vadd.f32 %v2081_v13, %v2080_v19  ;;  %v2246_v56 = vadd.f32 %v2245_v18, %v2244_v12  ;;  %v2312_v49 = vrot.slane %v2123_v14, 3  ;;  %v2341_v25 = vrot.slane %v2287_v48, 2 }
 0x900   : > { %v2093_v61 = vadd.f32 %v2092_v5, %v2091_v27  ;;  %v2345_v59 = vrot.slane %v2290_v2, 7  ;;  %v2271_v5 = vrot.slane %v3572_v37, 6 }
 0x901   : > { %v2247_v29 = vrot.slane %v2246_v56, 4  ;;  %v3778_v30 = vsel %vm2313_vm11, %v2312_v49, %v2311_v32  ;;  %v3781_v31 = vsel %vm2316_vm12, %v2341_v25, %v2340_v11  ;;  %v1893_v40 = vpop.permute.xlu2 %1892  ;;  %v2083_v51 = vrot.slane %v2082_v23, 4 }
 0x902   : > { %v1992_v32 = vmul.f32 %v1956_v36, %v1893_v40  ;;  %v2157_v55 = vmul.f32 %v1938_v6, %v1893_v40  ;;  %v2094_v34 = vrot.slane %v2093_v61, 2  ;;  %v2108_v36 = vrot.slane %v3577_v38, 7 }
 0x903   : > { %v2248_v33 = vadd.f32 %v2247_v29, %v2246_v56  ;;  %v2084_v47 = vadd.f32 %v2083_v51, %v2082_v23  ;;  %v2107_v51 = vrot.slane %v3577_v38, 6 }
 0x904   : > { %v2010_v62 = vsub.f32 %v1974_v26, %v1992_v32  ;;  %v2175_v63 = vadd.f32 %v2157_v55, %v2139_v46  ;;  %v2095_v14 = vadd.f32 %v2094_v34, %v2093_v61  ;;  %v2700_v34 = vld [vmem:[%s3895_s24] sm:$0xff] }
 0x905   : > { %v2249_v42 = vrot.slane %v2248_v33, 2  ;;  %v2085_v35 = vrot.slane %v2084_v47, 2 }
 0x906   : > { %v2071_v9 = vsel %vm2016_vm4, %v2010_v62, 0.0  ;;  %v2235_v15 = vsel %vm2016_vm4, %v2175_v63, 0.0  ;;  %v2096_v29 = vrot.slane %v2095_v14, 1 }
 0x907   : > { %v2250_v45 = vadd.f32 %v2249_v42, %v2248_v33  ;;  %v2086_v52 = vadd.f32 %v2085_v35, %v2084_v47 }
 0x908   : > { %v2097_v47 = vadd.f32 %v2096_v29, %v2095_v14 }
 0x909   : > { %v2251_v11 = vrot.slane %v2250_v45, 1  ;;  %v1782_v7 = vpop.permute.xlu1 %1781  ;;  %v2087_v24 = vrot.slane %v2086_v52, 1  ;;  %v2840_v33 = vpop.permute.xlu2 %2839 }
 0x90a   : > { %v1975_v22 = vmul.f32 %v1939_v53, %v1782_v7  ;;  %v2140_v10 = vmul.f32 %v1957_v39, %v1782_v7  ;;  %v2842_v32 = vunpack.i.h.bf16 %v2840_v33  ;;  %v2841_v55 = vunpack.i.l.bf16 %v2840_v33 }
 0x90b   : > { %v2252_v0 = vadd.f32 %v2251_v11, %v2250_v45  ;;  %v2088_v41 = vadd.f32 %v2087_v24, %v2086_v52  ;;  %v2099_v11 = vld [vmem:[%s3893_s22 + $0x8] sm:$0x1] }
 0x90c   : > { %v2011_v50 = vsub.f32 %v1975_v22, %v1993_v54  ;;  %v2176_v44 = vadd.f32 %v2158_v4, %v2140_v10  ;;  %v2126_v63 = vadd.f32 %v2099_v11, %v2097_v47 }
 0x90d   : > { %v2289_v1 = vadd.f32 %v2272_v57, %v2252_v0  ;;  %v2125_v61 = vadd.f32 %v2108_v36, %v2088_v41 }
 0x90e   : > { %v2072_v3 = vsel %vm2016_vm4, %v2011_v50, 0.0  ;;  %v2236_v16 = vsel %vm2016_vm4, %v2176_v44, 0.0 }
 0x90f   : > { %v2073_v60 = vadd.f32 %v2072_v3, %v2071_v9  ;;  %v2237_v17 = vadd.f32 %v2236_v16, %v2235_v15  ;;  %v2346_v58 = vsel %vm2301_vm5, %v2345_v59, %v2289_v1  ;;  %v2318_v22 = vrot.slane %v2125_v61, 1 }
 0x910   : > { %v2352_v13 = vpack.c.bf16 %v2346_v58, %v2346_v58 }
 0x911   : > { %v2074_v18 = vrot.slane %v2073_v60, 4  ;;  %v2238_v19 = vrot.slane %v2237_v17, 4  ;;  %v2835_v12 = vpop.permute.xlu1 %2834 }
 0x912   : > { %v2365_v48 = vsel %vm2349_vm13, %v2352_v13, 0  ;;  %v2837_v49 = vunpack.i.h.bf16 %v2835_v12  ;;  %v2836_v25 = vunpack.i.l.bf16 %v2835_v12 }
 0x913   : > { %v2075_v23 = vadd.f32 %v2074_v18, %v2073_v60  ;;  %v2239_v56 = vadd.f32 %v2238_v19, %v2237_v17  ;;  %2373 = vmatpush.bf16.msra.mxu3 %v2365_v48 }
 0x914   : > { %v1597_v53 = vsel %vm1497_vm0, %v3426_v21, %v2837_v49  ;;  %v1596_v39 = vsel %vm1497_vm0, %v3424_v20, %v2836_v25 }
 0x915   : > { %v2076_v27 = vrot.slane %v2075_v23, 2  ;;  %v2240_v28 = vrot.slane %v2239_v56, 2  ;;  %v1598_v38 = vsel %vm849_vm6, %v1596_v39, %v2841_v55  ;;  %v1599_v4 = vsel %vm849_vm6, %v1597_v53, %v2842_v32 }
 0x916   : > { %vm2360_vm6 = vcmask 146432  }
 0x917   : > { %v2077_v40 = vadd.f32 %v2076_v27, %v2075_v23  ;;  %v2241_v6 = vadd.f32 %v2240_v28, %v2239_v56 }
 0x919   : > { %v2078_v42 = vrot.slane %v2077_v40, 1  ;;  %v2242_v43 = vrot.slane %v2241_v6, 1  ;;  %v2845_v8 = vpop.permute.xlu1 %2844 }
 0x91a   : > { %v2847_v26 = vunpack.i.h.bf16 %v2845_v8  ;;  %v2846_v45 = vunpack.i.l.bf16 %v2845_v8 }
 0x91b   : > { %v2079_v46 = vadd.f32 %v2078_v42, %v2077_v40  ;;  %v2243_v54 = vadd.f32 %v2242_v43, %v2241_v6 }
 0x91c   : > { %v1600_v21 = vsel %vm1531_vm1, %v1598_v38, %v2846_v45  ;;  %v1601_v20 = vsel %vm1531_vm1, %v1599_v4, %v2847_v26 }
 0x91d   : > { %v1602_v37 = vpack.c.bf16 %v1601_v20, %v1600_v21  ;;  %v2124_v7 = vadd.f32 %v2107_v51, %v2079_v46  ;;  %v2288_v57 = vadd.f32 %v2271_v5, %v2243_v54 }
 0x91f   : > { %2642 = vmatmul.msk.bf16.vlgmr.msra.gmra.mxu0 %vm852_vm7, %v1602_v37  ;;  %v2315_v2 = vrot.slane %v2124_v7, 2  ;;  %v2343_v62 = vrot.slane %v2288_v57, 1 }
 0x921   : > { %v2317_v10 = vsel %vm2316_vm12, %v2315_v2, %v3778_v30  ;;  %v2344_v0 = vsel %vm2319_vm14, %v2343_v62, %v3781_v31  ;;  %v2856_v30 = vld [vmem:[%s3889_s18] ss:$0 sm:$0xff] }
 0x922   : > { %v2320_v35 = vsel %vm2319_vm14, %v2318_v22, %v2317_v10  ;;  %v2350_v50 = vsel %vm2349_vm13, %v2126_v63, %v2344_v0 }
 0x923   : > { %v2351_v44 = vpack.c.bf16 %v2350_v50, %v2320_v35 }
 0x925   : > { %2374 = vmatpush.bf16.msra.mxu3 %v2351_v44 }
 0x928   : > { %2653 = vmatmul.msk.bf16.vlgmr.msra.gmra.mxu3 %vm2360_vm6, %v2700_v34 }
 0x99c   : > { %v1651_v31 = vpop.f32.mrf.mxu0 }
 0x99d   : > { %v1652_v9 = vadd.f32 %v2856_v30, %v1651_v31 }
 0x9a4   : > { %v1653_v16 = vpop.f32.mrf.mxu0 }
 0x9a5   : > { %v1654_v60 = vadd.f32 %v2856_v30, %v1653_v16 }
 0x9ab   : > { %v2376_v1 = vpop.f32.mrf.mxu3 }
 0x9ac   : > { %2383 = vrot.lane.b32.xlu2 %v2376_v1, %s3912_s6 }
 0x9b3   : > { %v2378_v59 = vpop.f32.mrf.mxu3 }
 0x9b4   : > { %2385 = vrot.lane.b32.xlu0 %v2378_v59, %s3912_s6  ;;  %s2408_s6 = sshll.u32 %s2405_s10, 4  ;;  %s2409_s6 = int_to_ptr.hbm [resolvable:$true] %s2408_s6 }
 0x9b5   : > { %s2895_s8 = sshra.s32 %s2409_s6, 4  ;;  %s2896_s8 = int_to_ptr.hbm [resolvable:$true] %s2895_s8 }
 0x9b6   : > { %s2897_s7 = scalar_lea.hbm %s2896_s8, 16  ;;  %p2902_p0 = scmp.lt.s32.totalorder %s2896_s8, %s3896_s25 }
 0x9b7   : > { %p2898_p11 = scmp.ne.s32.totalorder %s2896_s8, %s2897_s7  ;;  %p2903_p1 = scmp.lt.s32.totalorder %s2901_s0, %s2897_s7 }
 0x9b9   : > { %p2899_p12 = pnand %p2898_p11, %p3119_p5  ;;  %p2904_p2 = por %p2903_p1, %p2902_p0 }
 0x9bb   : > { %p2900_p13 = pneg %p2899_p12 }
 0x9bd   : > { %p2905_p3 = pnand %p2904_p2, %p2900_p13 }
 0xa06   : > { %v2384_v15 = vpop.permute.xlu2 %2383 }
 0xa07   : > { %v2389_v3 = vsel %vm2016_vm4, %v1652_v9, %v2384_v15 }
 0xa08   : > { %2391 = vst.msk [vmem:[%s757_s1] sm:$0xff] %vm1497_vm0, %v2389_v3 }
 0xa26   : > { %v2386_v17 = vpop.permute.xlu0 %2385 }
 0xa27   : > { %v2390_v58 = vsel %vm2016_vm4, %v1654_v60, %v2386_v17 }
 0xa28   : > { %2392 = vst.msk [vmem:[%s757_s1 + $0x8] sm:$0xff] %vm1497_vm0, %v2390_v58 }
 0xa29   : > { %2908 = shalt.err (!%p2905_p3)
}
 0xa2a   : > { %s2950_s27 = smov 128   ;;  %s3947_s1 = smov 8  }
 0xa2b   : > { %2702 = dma.vmem_to_hbm [thread:$0]  (%p3119_p5), %s2407_s15, 256, %s2409_s6, %s2394_s5, %s2950_s27, %s2950_s27, %s3947_s1  }
 0xa2c PF: > { %p2708_p4 = scmp.ge.s32.totalorder %s2943_s30, 2  ;;  %s2423_s26 = sand.u32 1, %s2931_s29  }
 0xa2d   : > { %s2424_s9 = scalar_lea.sflag [#allocation3], %s2423_s26 }
 0xa2e   : > { %p2705_p7 = pnand %p2708_p4, %p3123_p6 }
 0xa30   : > { %p2706_p8 = pneg %p2705_p7 }
 0xa32   : > { %2926 = dma.done.wait (%p2706_p8), %s2424_s9, 256  }
 0xa33   : > { %2928 = vsyncadd (%p2706_p8), %s2424_s9, 4294967040  ;;  %s3949_s30 = sld [smem:[#allocation6_spill]]  ;;  %s3952_s29 = smov %s2935_s2 }
 0xa34   : > { %s3950_s8 = sld [smem:[#allocation5_spill]] }
 0xa35   : > { %s3951_s6 = sld [smem:[#allocation7_spill]] }
 0xa39   : > { %p35_p9 = scmp.ge.s32.totalorder %s3949_s30, 4  }
 0xa3a   : > { %s3953_s2 = smov %s3950_s8 }
 0xa3b   :  { %37 = sbr.rel (!%p35_p9) target bundleno = 17 (0x11), region = 155 }
 0xa40   :  { %2430 = vsyncpa [#allocation3], 1 }
 0xa41   :  { %2432 = vsyncpa [#allocation3 + $0x1], 1 }

</bundles_post_ra>
